<compile_context>
chip_gen: v7x
topology: tpu7x:2x2x1
jax: 0.10.0
libtpu: 0.0.40
codegen_flags: <defaults>
</compile_context>

<pallas_src>
import jax
import jax.numpy as jnp
from jax.experimental import pallas as pl
from jax.experimental.pallas import tpu as pltpu

EPS = 1e-5


def make_vgg_block_kernel(B, H, W, Cin, Cout, margin):
    Hp, Wp = H + 2, W + 2
    Npad = B * Hp * Wp          # padded-layout positions (valid + zero-pad rows/cols)
    N = B * H * W               # valid positions = BatchNorm population
    inv_n = 1.0 / N

    def conv3x3(w_ref, src_ref):
        """Nine accumulated (Cout, C) @ (C, Npad) matmuls over shifted padded-slab views."""
        acc = None
        t = 0
        for dh in (-1, 0, 1):
            for dw in (-1, 0, 1):
                s = margin + dh * Wp + dw            # static lane offset into the slab
                d = jnp.dot(w_ref[t], src_ref[:, s:s + Npad],
                            preferred_element_type=jnp.float32)
                acc = d if acc is None else acc + d
                t += 1
        return acc                                   # (Cout, Npad) f32

    def bn_relu(acc, g, be, mask):
        """Training-mode BatchNorm (biased variance over N valid positions) + ReLU, f32."""
        am = acc * mask                              # exclude pad positions from the stats
        mean = jnp.sum(am, axis=1, keepdims=True) * inv_n
        var = jnp.sum(am * am, axis=1, keepdims=True) * inv_n - mean * mean
        scale = jax.lax.rsqrt(var + EPS) * g         # (Cout, 1)
        shift = be - mean * scale                    # (Cout, 1)
        return jnp.maximum(acc * scale + shift, 0.0)

    def kernel(x_ref, w1_ref, g1_ref, be1_ref, w2_ref, g2_ref, be2_ref, mask_ref,
               o_ref, y1_ref, pool_ref):
        mask = mask_ref[...]                         # (1, Npad) f32, 1 at valid positions

        # ---- conv1 (bias cancelled by BN) + bn1 + relu.  y1's pad positions must be
        #      genuine zeros: they are conv2's zero padding. ----
        acc1 = conv3x3(w1_ref, x_ref)
        y1 = bn_relu(acc1, g1_ref[...], be1_ref[...], mask) * mask

        # ---- stage y1 into the margin-padded bf16 slab (single cast at the store);
        #      zero only the margins, bulk store starts lane-aligned at `margin`. ----
        y1_ref[:, :margin] = jnp.zeros((Cout, margin), y1_ref.dtype)
        y1_ref[:, margin + Npad:] = jnp.zeros((Cout, margin), y1_ref.dtype)
        y1_ref[:, margin:margin + Npad] = y1.astype(y1_ref.dtype)

        # ---- conv2 + bn2 + relu (pad positions stay garbage; pooling never reads them) ----
        acc2 = conv3x3(w2_ref, y1_ref)
        y2 = bn_relu(acc2, g2_ref[...], be2_ref[...], mask)

        # ---- maxpool 2x2 / stride 2: elementwise max of four shifted views (f32).
        #      Window max is emitted at every padded position; the valid 2x2 anchors sit at
        #      odd padded rows / even columns and only read valid positions.  The wrapper
        #      keeps the anchor positions (stride-2 decimation). ----
        pool_w = pool_ref.shape[1]
        pool_ref[:, Npad:] = jnp.zeros((Cout, pool_w - Npad), pool_ref.dtype)
        pool_ref[:, :Npad] = y2
        m = jnp.maximum(y2, pool_ref[:, 1:1 + Npad])
        m = jnp.maximum(m, pool_ref[:, Wp:Wp + Npad])
        m = jnp.maximum(m, pool_ref[:, Wp + 1:Wp + 1 + Npad])
        o_ref[...] = m                               # dense (Cout, Npad) f32 store

    return kernel


def _full_spec(shape):
    n = len(shape)
    return pl.BlockSpec(shape, lambda i, n=n: (0,) * n)


def vgg_block_forward(x_nchw, params):
    """Pallas implementation of VGGBlock.forward.  x_nchw: (B, Cin, H, W) float32."""
    w1, b1, g1, be1, w2, b2, g2, be2 = params
    del b1, b2  # conv biases are exactly cancelled by training-mode BN mean subtraction

    B, Cin, H, W = x_nchw.shape
    Cout = w1.shape[-1]
    assert H % 2 == 0 and W % 2 == 0
    Hp, Wp = H + 2, W + 2
    Npad = B * Hp * Wp
    margin = ((Wp + 1 + 127) // 128) * 128            # lane-aligned slab margin >= Wp + 1
    L = margin + Npad + margin

    # ---- image-padded input slab (Cin, L), bf16.  Asymmetric per-image padding: rows 0 and
    #      Hp-1 and cols W, W+1 are zero; valid data at rows 1..H, cols 0..W-1.  Every conv
    #      tap shift then reads genuine zero padding, and 2x2 pool pairs stay lane-aligned. --
    x = x_nchw.astype(jnp.float32)
    xpad = jnp.pad(x, ((0, 0), (0, 0), (1, 1), (0, 2)))           # (B, Cin, Hp, Wp)
    x_flat = jnp.transpose(xpad, (1, 0, 2, 3)).reshape(Cin, Npad)
    x_slab = jnp.pad(x_flat, ((0, 0), (margin, margin))).astype(jnp.bfloat16)

    # ---- per-tap weight blocks for the transposed (C, N) matmuls, bf16 (MXU-native) ----
    w1t = jnp.transpose(w1.reshape(9, Cin, Cout), (0, 2, 1)).astype(jnp.bfloat16)   # (9,Cout,Cin)
    w2t = jnp.transpose(w2.reshape(9, Cout, Cout), (0, 2, 1)).astype(jnp.bfloat16)  # (9,Cout,Cout)

    # ---- interior-position mask (1, Npad): 1 at valid (b, h, w), 0 at pad rows/cols ----
    row_valid = jnp.pad(jnp.ones((H,), jnp.float32), (1, 1))      # (Hp,)
    col_valid = jnp.pad(jnp.ones((W,), jnp.float32), (0, 2))      # (Wp,)
    mask = jnp.tile((row_valid[:, None] * col_valid[None, :]).reshape(-1), (B,))
    mask = mask.reshape(1, Npad)

    inputs = (
        x_slab, w1t,
        g1.reshape(Cout, 1).astype(jnp.float32), be1.reshape(Cout, 1).astype(jnp.float32),
        w2t,
        g2.reshape(Cout, 1).astype(jnp.float32), be2.reshape(Cout, 1).astype(jnp.float32),
        mask,
    )
    out_shape = jax.ShapeDtypeStruct((Cout, Npad), jnp.float32)

    kernel = make_vgg_block_kernel(B, H, W, Cin, Cout, margin)

    out = pl.pallas_call(
        kernel,
        out_shape=out_shape,
        grid_spec=pltpu.PrefetchScalarGridSpec(
            num_scalar_prefetch=0,
            grid=(1,),
            in_specs=[_full_spec(a.shape) for a in inputs],
            out_specs=_full_spec(out_shape.shape),
            scratch_shapes=[
                pltpu.VMEM((Cout, L), jnp.bfloat16),              # y1 slab (conv2 operand)
                pltpu.VMEM((Cout, Npad + Wp + 2), jnp.float32),   # pooling shift slab
            ],
        ),
        compiler_params=pltpu.CompilerParams(
            dimension_semantics=("arbitrary",),
            vmem_limit_bytes=48 * 1024 * 1024,
        ),
    )(*inputs)

    # 2x2/stride-2 pool anchors sit at odd padded rows / even padded cols; keep those.
    # TODO(synk): for large shapes, switch to a tiled two-pass BN grid (megacore-parallel)
    # and emit the decimated output directly from the kernel instead of this XLA slice.
    pooled = out.reshape(Cout, B, Hp, Wp)[:, :, 1:1 + H:2, 0:W:2]  # (Cout, B, H//2, W//2)
    return jnp.transpose(pooled, (1, 0, 2, 3))                     # -> NCHW


def reference_forward(x_nchw, params, *, matmul_dtype=jnp.float32,
                      precision=jax.lax.Precision.HIGHEST):
    """Pure-JAX reference (true module semantics incl. conv biases)."""
    w1, b1, g1, be1, w2, b2, g2, be2 = params
    x = jnp.transpose(x_nchw, (0, 2, 3, 1)).astype(jnp.float32)

    def conv(x, w, b):
        y = jax.lax.conv_general_dilated(
            x.astype(matmul_dtype), w.astype(matmul_dtype),
            window_strides=(1, 1), padding="SAME",
            dimension_numbers=("NHWC", "HWIO", "NHWC"),
            precision=precision, preferred_element_type=jnp.float32)
        return y + b

    def bn_relu(y, g, be):
        m = jnp.mean(y, axis=(0, 1, 2), keepdims=True)
        v = jnp.mean((y - m) ** 2, axis=(0, 1, 2), keepdims=True)
        return jnp.maximum((y - m) * jax.lax.rsqrt(v + EPS) * g + be, 0.0)

    y = bn_relu(conv(x, w1, b1), g1, be1)
    y = bn_relu(conv(y, w2, b2), g2, be2)
    B, H, W, C = y.shape
    y = y.reshape(B, H // 2, 2, W // 2, 2, C).max(axis=(2, 4))
    return jnp.transpose(y, (0, 3, 1, 2))


def init_params(key, in_channels, out_channels):
    ks = jax.random.split(key, 8)
    w1 = 0.3 * jax.random.normal(ks[0], (3, 3, in_channels, out_channels), jnp.float32)
    b1 = 0.1 * jax.random.normal(ks[1], (out_channels,), jnp.float32)
    g1 = 1.0 + 0.1 * jax.random.normal(ks[2], (out_channels,), jnp.float32)
    be1 = 0.1 * jax.random.normal(ks[3], (out_channels,), jnp.float32)
    w2 = 0.3 * jax.random.normal(ks[4], (3, 3, out_channels, out_channels), jnp.float32)
    b2 = 0.1 * jax.random.normal(ks[5], (out_channels,), jnp.float32)
    g2 = 1.0 + 0.1 * jax.random.normal(ks[6], (out_channels,), jnp.float32)
    be2 = 0.1 * jax.random.normal(ks[7], (out_channels,), jnp.float32)
    return (w1, b1, g1, be1, w2, b2, g2, be2)


if __name__ == "__main__":
    key = jax.random.PRNGKey(0)
    k_x, k_p = jax.random.split(key)

    B, Cin, Cout, H, W = 2, 4, 8, 16, 16
    x = jax.random.normal(k_x, (B, Cin, H, W), jnp.float32)        # NCHW, like PyTorch
    params = init_params(k_p, Cin, Cout)

    fwd = jax.jit(vgg_block_forward)
    out = jax.block_until_ready(fwd(x, params))
    assert out.shape == (B, Cout, H // 2, W // 2), out.shape

    # 1) matched-precision reference (bf16 MXU inputs, f32 accumulation): checks the kernel's
    #    tap ordering / padded layout, BN stats, zero-padding handling and pooling logic.
    ref_bf16 = jax.block_until_ready(
        reference_forward(x, params, matmul_dtype=jnp.bfloat16,
                          precision=jax.lax.Precision.DEFAULT))
    err_m = float(jnp.max(jnp.abs(out - ref_bf16)))
    assert jnp.allclose(out, ref_bf16, atol=1e-2, rtol=1e-2), err_m

    # 2) full-f32 module semantics: loose check covering the bf16 MXU-input quantization.
    ref_f32 = jax.block_until_ready(reference_forward(x, params))
    err_f = float(jnp.max(jnp.abs(out - ref_f32)))
    assert jnp.allclose(out, ref_f32, atol=6e-2, rtol=6e-2), err_f

    print("KERNEL_OK")
</pallas_src>

<mosaic_0001>
module attributes {stable_mosaic.version = 11 : i64} {
  func.func @kernel(%arg0: i32, %arg1: memref<4x904xbf16, #tpu.memory_space<vmem>>, %arg2: memref<9x8x4xbf16, #tpu.memory_space<vmem>>, %arg3: memref<8x1xf32, #tpu.memory_space<vmem>>, %arg4: memref<8x1xf32, #tpu.memory_space<vmem>>, %arg5: memref<9x8x8xbf16, #tpu.memory_space<vmem>>, %arg6: memref<8x1xf32, #tpu.memory_space<vmem>>, %arg7: memref<8x1xf32, #tpu.memory_space<vmem>>, %arg8: memref<1x648xf32, #tpu.memory_space<vmem>>, %arg9: memref<8x648xf32, #tpu.memory_space<vmem>>, %arg10: memref<8x904xbf16, #tpu.memory_space<vmem>>, %arg11: memref<8x668xf32, #tpu.memory_space<vmem>>) attributes {dimension_semantics = [#tpu.dimension_semantics<arbitrary>], iteration_bounds = array<i64: 1>, scalar_prefetch = 0 : i64, scratch_operands = 2 : i64, tpu.core_type = #tpu.core_type<tc>, window_params = [{pipeline_mode = #tpu.pipeline_mode<synchronous>, transform_indices = @transform_0, window_bounds = array<i64: 4, 904>}, {pipeline_mode = #tpu.pipeline_mode<synchronous>, transform_indices = @transform_1, window_bounds = array<i64: 9, 8, 4>}, {pipeline_mode = #tpu.pipeline_mode<synchronous>, transform_indices = @transform_2, window_bounds = array<i64: 8, 1>}, {pipeline_mode = #tpu.pipeline_mode<synchronous>, transform_indices = @transform_3, window_bounds = array<i64: 8, 1>}, {pipeline_mode = #tpu.pipeline_mode<synchronous>, transform_indices = @transform_4, window_bounds = array<i64: 9, 8, 8>}, {pipeline_mode = #tpu.pipeline_mode<synchronous>, transform_indices = @transform_5, window_bounds = array<i64: 8, 1>}, {pipeline_mode = #tpu.pipeline_mode<synchronous>, transform_indices = @transform_6, window_bounds = array<i64: 8, 1>}, {pipeline_mode = #tpu.pipeline_mode<synchronous>, transform_indices = @transform_7, window_bounds = array<i64: 1, 648>}, {pipeline_mode = #tpu.pipeline_mode<synchronous>, transform_indices = @transform_8, window_bounds = array<i64: 8, 648>}]} {
    %c0 = arith.constant 0 : index
    %c0_0 = arith.constant 0 : index
    %0 = vector.load %arg8[%c0, %c0_0] : memref<1x648xf32, #tpu.memory_space<vmem>>, vector<1x648xf32>
    %c0_1 = arith.constant 0 : index
    %c0_2 = arith.constant 0 : index
    %c0_3 = arith.constant 0 : index
    %1 = vector.load %arg2[%c0_1, %c0_2, %c0_3] : memref<9x8x4xbf16, #tpu.memory_space<vmem>>, vector<1x8x4xbf16>
    %2 = vector.shape_cast %1 : vector<1x8x4xbf16> to vector<8x4xbf16>
    %c0_4 = arith.constant 0 : index
    %c109 = arith.constant 109 : index
    %3 = vector.load %arg1[%c0_4, %c109] : memref<4x904xbf16, #tpu.memory_space<vmem>>, vector<4x648xbf16>
    %cst = arith.constant dense<0.000000e+00> : vector<8x648xf32>
    %4 = tpu.matmul %2, %3, %cst {dimension_numbers = #tpu.dot_dimension_numbers<[1], [0], [0], [1], [0, 0, 1, 1], [], []>} : vector<8x4xbf16>, vector<4x648xbf16>, vector<8x648xf32> -> vector<8x648xf32>
    %c1 = arith.constant 1 : index
    %c0_5 = arith.constant 0 : index
    %c0_6 = arith.constant 0 : index
    %5 = vector.load %arg2[%c1, %c0_5, %c0_6] : memref<9x8x4xbf16, #tpu.memory_space<vmem>>, vector<1x8x4xbf16>
    %6 = vector.shape_cast %5 : vector<1x8x4xbf16> to vector<8x4xbf16>
    %c0_7 = arith.constant 0 : index
    %c110 = arith.constant 110 : index
    %7 = vector.load %arg1[%c0_7, %c110] : memref<4x904xbf16, #tpu.memory_space<vmem>>, vector<4x648xbf16>
    %cst_8 = arith.constant dense<0.000000e+00> : vector<8x648xf32>
    %8 = tpu.matmul %6, %7, %cst_8 {dimension_numbers = #tpu.dot_dimension_numbers<[1], [0], [0], [1], [0, 0, 1, 1], [], []>} : vector<8x4xbf16>, vector<4x648xbf16>, vector<8x648xf32> -> vector<8x648xf32>
    %9 = arith.addf %4, %8 : vector<8x648xf32>
    %c2 = arith.constant 2 : index
    %c0_9 = arith.constant 0 : index
    %c0_10 = arith.constant 0 : index
    %10 = vector.load %arg2[%c2, %c0_9, %c0_10] : memref<9x8x4xbf16, #tpu.memory_space<vmem>>, vector<1x8x4xbf16>
    %11 = vector.shape_cast %10 : vector<1x8x4xbf16> to vector<8x4xbf16>
    %c0_11 = arith.constant 0 : index
    %c111 = arith.constant 111 : index
    %12 = vector.load %arg1[%c0_11, %c111] : memref<4x904xbf16, #tpu.memory_space<vmem>>, vector<4x648xbf16>
    %cst_12 = arith.constant dense<0.000000e+00> : vector<8x648xf32>
    %13 = tpu.matmul %11, %12, %cst_12 {dimension_numbers = #tpu.dot_dimension_numbers<[1], [0], [0], [1], [0, 0, 1, 1], [], []>} : vector<8x4xbf16>, vector<4x648xbf16>, vector<8x648xf32> -> vector<8x648xf32>
    %14 = arith.addf %9, %13 : vector<8x648xf32>
    %c3 = arith.constant 3 : index
    %c0_13 = arith.constant 0 : index
    %c0_14 = arith.constant 0 : index
    %15 = vector.load %arg2[%c3, %c0_13, %c0_14] : memref<9x8x4xbf16, #tpu.memory_space<vmem>>, vector<1x8x4xbf16>
    %16 = vector.shape_cast %15 : vector<1x8x4xbf16> to vector<8x4xbf16>
    %c0_15 = arith.constant 0 : index
    %c127 = arith.constant 127 : index
    %17 = vector.load %arg1[%c0_15, %c127] : memref<4x904xbf16, #tpu.memory_space<vmem>>, vector<4x648xbf16>
    %cst_16 = arith.constant dense<0.000000e+00> : vector<8x648xf32>
    %18 = tpu.matmul %16, %17, %cst_16 {dimension_numbers = #tpu.dot_dimension_numbers<[1], [0], [0], [1], [0, 0, 1, 1], [], []>} : vector<8x4xbf16>, vector<4x648xbf16>, vector<8x648xf32> -> vector<8x648xf32>
    %19 = arith.addf %14, %18 : vector<8x648xf32>
    %c4 = arith.constant 4 : index
    %c0_17 = arith.constant 0 : index
    %c0_18 = arith.constant 0 : index
    %20 = vector.load %arg2[%c4, %c0_17, %c0_18] : memref<9x8x4xbf16, #tpu.memory_space<vmem>>, vector<1x8x4xbf16>
    %21 = vector.shape_cast %20 : vector<1x8x4xbf16> to vector<8x4xbf16>
    %c0_19 = arith.constant 0 : index
    %c128 = arith.constant 128 : index
    %22 = vector.load %arg1[%c0_19, %c128] : memref<4x904xbf16, #tpu.memory_space<vmem>>, vector<4x648xbf16>
    %cst_20 = arith.constant dense<0.000000e+00> : vector<8x648xf32>
    %23 = tpu.matmul %21, %22, %cst_20 {dimension_numbers = #tpu.dot_dimension_numbers<[1], [0], [0], [1], [0, 0, 1, 1], [], []>} : vector<8x4xbf16>, vector<4x648xbf16>, vector<8x648xf32> -> vector<8x648xf32>
    %24 = arith.addf %19, %23 : vector<8x648xf32>
    %c5 = arith.constant 5 : index
    %c0_21 = arith.constant 0 : index
    %c0_22 = arith.constant 0 : index
    %25 = vector.load %arg2[%c5, %c0_21, %c0_22] : memref<9x8x4xbf16, #tpu.memory_space<vmem>>, vector<1x8x4xbf16>
    %26 = vector.shape_cast %25 : vector<1x8x4xbf16> to vector<8x4xbf16>
    %c0_23 = arith.constant 0 : index
    %c129 = arith.constant 129 : index
    %27 = vector.load %arg1[%c0_23, %c129] : memref<4x904xbf16, #tpu.memory_space<vmem>>, vector<4x648xbf16>
    %cst_24 = arith.constant dense<0.000000e+00> : vector<8x648xf32>
    %28 = tpu.matmul %26, %27, %cst_24 {dimension_numbers = #tpu.dot_dimension_numbers<[1], [0], [0], [1], [0, 0, 1, 1], [], []>} : vector<8x4xbf16>, vector<4x648xbf16>, vector<8x648xf32> -> vector<8x648xf32>
    %29 = arith.addf %24, %28 : vector<8x648xf32>
    %c6 = arith.constant 6 : index
    %c0_25 = arith.constant 0 : index
    %c0_26 = arith.constant 0 : index
    %30 = vector.load %arg2[%c6, %c0_25, %c0_26] : memref<9x8x4xbf16, #tpu.memory_space<vmem>>, vector<1x8x4xbf16>
    %31 = vector.shape_cast %30 : vector<1x8x4xbf16> to vector<8x4xbf16>
    %c0_27 = arith.constant 0 : index
    %c145 = arith.constant 145 : index
    %32 = vector.load %arg1[%c0_27, %c145] : memref<4x904xbf16, #tpu.memory_space<vmem>>, vector<4x648xbf16>
    %cst_28 = arith.constant dense<0.000000e+00> : vector<8x648xf32>
    %33 = tpu.matmul %31, %32, %cst_28 {dimension_numbers = #tpu.dot_dimension_numbers<[1], [0], [0], [1], [0, 0, 1, 1], [], []>} : vector<8x4xbf16>, vector<4x648xbf16>, vector<8x648xf32> -> vector<8x648xf32>
    %34 = arith.addf %29, %33 : vector<8x648xf32>
    %c7 = arith.constant 7 : index
    %c0_29 = arith.constant 0 : index
    %c0_30 = arith.constant 0 : index
    %35 = vector.load %arg2[%c7, %c0_29, %c0_30] : memref<9x8x4xbf16, #tpu.memory_space<vmem>>, vector<1x8x4xbf16>
    %36 = vector.shape_cast %35 : vector<1x8x4xbf16> to vector<8x4xbf16>
    %c0_31 = arith.constant 0 : index
    %c146 = arith.constant 146 : index
    %37 = vector.load %arg1[%c0_31, %c146] : memref<4x904xbf16, #tpu.memory_space<vmem>>, vector<4x648xbf16>
    %cst_32 = arith.constant dense<0.000000e+00> : vector<8x648xf32>
    %38 = tpu.matmul %36, %37, %cst_32 {dimension_numbers = #tpu.dot_dimension_numbers<[1], [0], [0], [1], [0, 0, 1, 1], [], []>} : vector<8x4xbf16>, vector<4x648xbf16>, vector<8x648xf32> -> vector<8x648xf32>
    %39 = arith.addf %34, %38 : vector<8x648xf32>
    %c8 = arith.constant 8 : index
    %c0_33 = arith.constant 0 : index
    %c0_34 = arith.constant 0 : index
    %40 = vector.load %arg2[%c8, %c0_33, %c0_34] : memref<9x8x4xbf16, #tpu.memory_space<vmem>>, vector<1x8x4xbf16>
    %41 = vector.shape_cast %40 : vector<1x8x4xbf16> to vector<8x4xbf16>
    %c0_35 = arith.constant 0 : index
    %c147 = arith.constant 147 : index
    %42 = vector.load %arg1[%c0_35, %c147] : memref<4x904xbf16, #tpu.memory_space<vmem>>, vector<4x648xbf16>
    %cst_36 = arith.constant dense<0.000000e+00> : vector<8x648xf32>
    %43 = tpu.matmul %41, %42, %cst_36 {dimension_numbers = #tpu.dot_dimension_numbers<[1], [0], [0], [1], [0, 0, 1, 1], [], []>} : vector<8x4xbf16>, vector<4x648xbf16>, vector<8x648xf32> -> vector<8x648xf32>
    %44 = arith.addf %39, %43 : vector<8x648xf32>
    %c0_37 = arith.constant 0 : index
    %c0_38 = arith.constant 0 : index
    %45 = vector.load %arg3[%c0_37, %c0_38] : memref<8x1xf32, #tpu.memory_space<vmem>>, vector<8x1xf32>
    %c0_39 = arith.constant 0 : index
    %c0_40 = arith.constant 0 : index
    %46 = vector.load %arg4[%c0_39, %c0_40] : memref<8x1xf32, #tpu.memory_space<vmem>>, vector<8x1xf32>
    %47 = vector.broadcast %0 : vector<1x648xf32> to vector<8x648xf32>
    %48 = arith.mulf %44, %47 : vector<8x648xf32>
    %cst_41 = arith.constant dense<0.000000e+00> : vector<8xf32>
    %49 = vector.multi_reduction <add>, %48, %cst_41 [1] : vector<8x648xf32> to vector<8xf32>
    %50 = vector.shape_cast %49 : vector<8xf32> to vector<8x1xf32>
    %cst_42 = arith.constant 0.001953125 : f32
    %51 = vector.broadcast %cst_42 : f32 to vector<8x1xf32>
    %52 = arith.mulf %50, %51 : vector<8x1xf32>
    %53 = arith.mulf %48, %48 : vector<8x648xf32>
    %cst_43 = arith.constant dense<0.000000e+00> : vector<8xf32>
    %54 = vector.multi_reduction <add>, %53, %cst_43 [1] : vector<8x648xf32> to vector<8xf32>
    %55 = vector.shape_cast %54 : vector<8xf32> to vector<8x1xf32>
    %cst_44 = arith.constant 0.001953125 : f32
    %56 = vector.broadcast %cst_44 : f32 to vector<8x1xf32>
    %57 = arith.mulf %55, %56 : vector<8x1xf32>
    %58 = arith.mulf %52, %52 : vector<8x1xf32>
    %59 = arith.subf %57, %58 : vector<8x1xf32>
    %cst_45 = arith.constant 9.99999974E-6 : f32
    %60 = vector.broadcast %cst_45 : f32 to vector<8x1xf32>
    %61 = arith.addf %59, %60 : vector<8x1xf32>
    %62 = math.rsqrt %61 : vector<8x1xf32>
    %63 = arith.mulf %62, %45 : vector<8x1xf32>
    %64 = arith.mulf %52, %63 : vector<8x1xf32>
    %65 = arith.subf %46, %64 : vector<8x1xf32>
    %66 = vector.broadcast %63 : vector<8x1xf32> to vector<8x648xf32>
    %67 = arith.mulf %44, %66 : vector<8x648xf32>
    %68 = vector.broadcast %65 : vector<8x1xf32> to vector<8x648xf32>
    %69 = arith.addf %67, %68 : vector<8x648xf32>
    %cst_46 = arith.constant 0.000000e+00 : f32
    %70 = vector.broadcast %cst_46 : f32 to vector<8x648xf32>
    %71 = arith.maximumf %69, %70 : vector<8x648xf32>
    %72 = vector.broadcast %0 : vector<1x648xf32> to vector<8x648xf32>
    %73 = arith.mulf %71, %72 : vector<8x648xf32>
    %cst_47 = arith.constant 0.000000e+00 : bf16
    %74 = vector.broadcast %cst_47 : bf16 to vector<8x128xbf16>
    %c0_48 = arith.constant 0 : index
    %c0_49 = arith.constant 0 : index
    %75 = vector.load %arg10[%c0_48, %c0_49] : memref<8x904xbf16, #tpu.memory_space<vmem>>, vector<8x128xbf16>
    tpu.vector_store %arg10[%c0_48, %c0_49], %74 {strides = array<i32>} : memref<8x904xbf16, #tpu.memory_space<vmem>>, vector<8x128xbf16>,
    %cst_50 = arith.constant 0.000000e+00 : bf16
    %76 = vector.broadcast %cst_50 : bf16 to vector<8x128xbf16>
    %c0_51 = arith.constant 0 : index
    %c776 = arith.constant 776 : index
    %77 = vector.load %arg10[%c0_51, %c776] : memref<8x904xbf16, #tpu.memory_space<vmem>>, vector<8x128xbf16>
    tpu.vector_store %arg10[%c0_51, %c776], %76 {strides = array<i32>} : memref<8x904xbf16, #tpu.memory_space<vmem>>, vector<8x128xbf16>,
    %78 = arith.truncf %73 : vector<8x648xf32> to vector<8x648xbf16>
    %c0_52 = arith.constant 0 : index
    %c128_53 = arith.constant 128 : index
    %79 = vector.load %arg10[%c0_52, %c128_53] : memref<8x904xbf16, #tpu.memory_space<vmem>>, vector<8x648xbf16>
    tpu.vector_store %arg10[%c0_52, %c128_53], %78 {strides = array<i32>} : memref<8x904xbf16, #tpu.memory_space<vmem>>, vector<8x648xbf16>,
    %c0_54 = arith.constant 0 : index
    %c0_55 = arith.constant 0 : index
    %c0_56 = arith.constant 0 : index
    %80 = vector.load %arg5[%c0_54, %c0_55, %c0_56] : memref<9x8x8xbf16, #tpu.memory_space<vmem>>, vector<1x8x8xbf16>
    %81 = vector.shape_cast %80 : vector<1x8x8xbf16> to vector<8x8xbf16>
    %c0_57 = arith.constant 0 : index
    %c109_58 = arith.constant 109 : index
    %82 = vector.load %arg10[%c0_57, %c109_58] : memref<8x904xbf16, #tpu.memory_space<vmem>>, vector<8x648xbf16>
    %cst_59 = arith.constant dense<0.000000e+00> : vector<8x648xf32>
    %83 = tpu.matmul %81, %82, %cst_59 {dimension_numbers = #tpu.dot_dimension_numbers<[1], [0], [0], [1], [0, 0, 1, 1], [], []>} : vector<8x8xbf16>, vector<8x648xbf16>, vector<8x648xf32> -> vector<8x648xf32>
    %c1_60 = arith.constant 1 : index
    %c0_61 = arith.constant 0 : index
    %c0_62 = arith.constant 0 : index
    %84 = vector.load %arg5[%c1_60, %c0_61, %c0_62] : memref<9x8x8xbf16, #tpu.memory_space<vmem>>, vector<1x8x8xbf16>
    %85 = vector.shape_cast %84 : vector<1x8x8xbf16> to vector<8x8xbf16>
    %c0_63 = arith.constant 0 : index
    %c110_64 = arith.constant 110 : index
    %86 = vector.load %arg10[%c0_63, %c110_64] : memref<8x904xbf16, #tpu.memory_space<vmem>>, vector<8x648xbf16>
    %cst_65 = arith.constant dense<0.000000e+00> : vector<8x648xf32>
    %87 = tpu.matmul %85, %86, %cst_65 {dimension_numbers = #tpu.dot_dimension_numbers<[1], [0], [0], [1], [0, 0, 1, 1], [], []>} : vector<8x8xbf16>, vector<8x648xbf16>, vector<8x648xf32> -> vector<8x648xf32>
    %88 = arith.addf %83, %87 : vector<8x648xf32>
    %c2_66 = arith.constant 2 : index
    %c0_67 = arith.constant 0 : index
    %c0_68 = arith.constant 0 : index
    %89 = vector.load %arg5[%c2_66, %c0_67, %c0_68] : memref<9x8x8xbf16, #tpu.memory_space<vmem>>, vector<1x8x8xbf16>
    %90 = vector.shape_cast %89 : vector<1x8x8xbf16> to vector<8x8xbf16>
    %c0_69 = arith.constant 0 : index
    %c111_70 = arith.constant 111 : index
    %91 = vector.load %arg10[%c0_69, %c111_70] : memref<8x904xbf16, #tpu.memory_space<vmem>>, vector<8x648xbf16>
    %cst_71 = arith.constant dense<0.000000e+00> : vector<8x648xf32>
    %92 = tpu.matmul %90, %91, %cst_71 {dimension_numbers = #tpu.dot_dimension_numbers<[1], [0], [0], [1], [0, 0, 1, 1], [], []>} : vector<8x8xbf16>, vector<8x648xbf16>, vector<8x648xf32> -> vector<8x648xf32>
    %93 = arith.addf %88, %92 : vector<8x648xf32>
    %c3_72 = arith.constant 3 : index
    %c0_73 = arith.constant 0 : index
    %c0_74 = arith.constant 0 : index
    %94 = vector.load %arg5[%c3_72, %c0_73, %c0_74] : memref<9x8x8xbf16, #tpu.memory_space<vmem>>, vector<1x8x8xbf16>
    %95 = vector.shape_cast %94 : vector<1x8x8xbf16> to vector<8x8xbf16>
    %c0_75 = arith.constant 0 : index
    %c127_76 = arith.constant 127 : index
    %96 = vector.load %arg10[%c0_75, %c127_76] : memref<8x904xbf16, #tpu.memory_space<vmem>>, vector<8x648xbf16>
    %cst_77 = arith.constant dense<0.000000e+00> : vector<8x648xf32>
    %97 = tpu.matmul %95, %96, %cst_77 {dimension_numbers = #tpu.dot_dimension_numbers<[1], [0], [0], [1], [0, 0, 1, 1], [], []>} : vector<8x8xbf16>, vector<8x648xbf16>, vector<8x648xf32> -> vector<8x648xf32>
    %98 = arith.addf %93, %97 : vector<8x648xf32>
    %c4_78 = arith.constant 4 : index
    %c0_79 = arith.constant 0 : index
    %c0_80 = arith.constant 0 : index
    %99 = vector.load %arg5[%c4_78, %c0_79, %c0_80] : memref<9x8x8xbf16, #tpu.memory_space<vmem>>, vector<1x8x8xbf16>
    %100 = vector.shape_cast %99 : vector<1x8x8xbf16> to vector<8x8xbf16>
    %c0_81 = arith.constant 0 : index
    %c128_82 = arith.constant 128 : index
    %101 = vector.load %arg10[%c0_81, %c128_82] : memref<8x904xbf16, #tpu.memory_space<vmem>>, vector<8x648xbf16>
    %cst_83 = arith.constant dense<0.000000e+00> : vector<8x648xf32>
    %102 = tpu.matmul %100, %101, %cst_83 {dimension_numbers = #tpu.dot_dimension_numbers<[1], [0], [0], [1], [0, 0, 1, 1], [], []>} : vector<8x8xbf16>, vector<8x648xbf16>, vector<8x648xf32> -> vector<8x648xf32>
    %103 = arith.addf %98, %102 : vector<8x648xf32>
    %c5_84 = arith.constant 5 : index
    %c0_85 = arith.constant 0 : index
    %c0_86 = arith.constant 0 : index
    %104 = vector.load %arg5[%c5_84, %c0_85, %c0_86] : memref<9x8x8xbf16, #tpu.memory_space<vmem>>, vector<1x8x8xbf16>
    %105 = vector.shape_cast %104 : vector<1x8x8xbf16> to vector<8x8xbf16>
    %c0_87 = arith.constant 0 : index
    %c129_88 = arith.constant 129 : index
    %106 = vector.load %arg10[%c0_87, %c129_88] : memref<8x904xbf16, #tpu.memory_space<vmem>>, vector<8x648xbf16>
    %cst_89 = arith.constant dense<0.000000e+00> : vector<8x648xf32>
    %107 = tpu.matmul %105, %106, %cst_89 {dimension_numbers = #tpu.dot_dimension_numbers<[1], [0], [0], [1], [0, 0, 1, 1], [], []>} : vector<8x8xbf16>, vector<8x648xbf16>, vector<8x648xf32> -> vector<8x648xf32>
    %108 = arith.addf %103, %107 : vector<8x648xf32>
    %c6_90 = arith.constant 6 : index
    %c0_91 = arith.constant 0 : index
    %c0_92 = arith.constant 0 : index
    %109 = vector.load %arg5[%c6_90, %c0_91, %c0_92] : memref<9x8x8xbf16, #tpu.memory_space<vmem>>, vector<1x8x8xbf16>
    %110 = vector.shape_cast %109 : vector<1x8x8xbf16> to vector<8x8xbf16>
    %c0_93 = arith.constant 0 : index
    %c145_94 = arith.constant 145 : index
    %111 = vector.load %arg10[%c0_93, %c145_94] : memref<8x904xbf16, #tpu.memory_space<vmem>>, vector<8x648xbf16>
    %cst_95 = arith.constant dense<0.000000e+00> : vector<8x648xf32>
    %112 = tpu.matmul %110, %111, %cst_95 {dimension_numbers = #tpu.dot_dimension_numbers<[1], [0], [0], [1], [0, 0, 1, 1], [], []>} : vector<8x8xbf16>, vector<8x648xbf16>, vector<8x648xf32> -> vector<8x648xf32>
    %113 = arith.addf %108, %112 : vector<8x648xf32>
    %c7_96 = arith.constant 7 : index
    %c0_97 = arith.constant 0 : index
    %c0_98 = arith.constant 0 : index
    %114 = vector.load %arg5[%c7_96, %c0_97, %c0_98] : memref<9x8x8xbf16, #tpu.memory_space<vmem>>, vector<1x8x8xbf16>
    %115 = vector.shape_cast %114 : vector<1x8x8xbf16> to vector<8x8xbf16>
    %c0_99 = arith.constant 0 : index
    %c146_100 = arith.constant 146 : index
    %116 = vector.load %arg10[%c0_99, %c146_100] : memref<8x904xbf16, #tpu.memory_space<vmem>>, vector<8x648xbf16>
    %cst_101 = arith.constant dense<0.000000e+00> : vector<8x648xf32>
    %117 = tpu.matmul %115, %116, %cst_101 {dimension_numbers = #tpu.dot_dimension_numbers<[1], [0], [0], [1], [0, 0, 1, 1], [], []>} : vector<8x8xbf16>, vector<8x648xbf16>, vector<8x648xf32> -> vector<8x648xf32>
    %118 = arith.addf %113, %117 : vector<8x648xf32>
    %c8_102 = arith.constant 8 : index
    %c0_103 = arith.constant 0 : index
    %c0_104 = arith.constant 0 : index
    %119 = vector.load %arg5[%c8_102, %c0_103, %c0_104] : memref<9x8x8xbf16, #tpu.memory_space<vmem>>, vector<1x8x8xbf16>
    %120 = vector.shape_cast %119 : vector<1x8x8xbf16> to vector<8x8xbf16>
    %c0_105 = arith.constant 0 : index
    %c147_106 = arith.constant 147 : index
    %121 = vector.load %arg10[%c0_105, %c147_106] : memref<8x904xbf16, #tpu.memory_space<vmem>>, vector<8x648xbf16>
    %cst_107 = arith.constant dense<0.000000e+00> : vector<8x648xf32>
    %122 = tpu.matmul %120, %121, %cst_107 {dimension_numbers = #tpu.dot_dimension_numbers<[1], [0], [0], [1], [0, 0, 1, 1], [], []>} : vector<8x8xbf16>, vector<8x648xbf16>, vector<8x648xf32> -> vector<8x648xf32>
    %123 = arith.addf %118, %122 : vector<8x648xf32>
    %c0_108 = arith.constant 0 : index
    %c0_109 = arith.constant 0 : index
    %124 = vector.load %arg6[%c0_108, %c0_109] : memref<8x1xf32, #tpu.memory_space<vmem>>, vector<8x1xf32>
    %c0_110 = arith.constant 0 : index
    %c0_111 = arith.constant 0 : index
    %125 = vector.load %arg7[%c0_110, %c0_111] : memref<8x1xf32, #tpu.memory_space<vmem>>, vector<8x1xf32>
    %126 = vector.broadcast %0 : vector<1x648xf32> to vector<8x648xf32>
    %127 = arith.mulf %123, %126 : vector<8x648xf32>
    %cst_112 = arith.constant dense<0.000000e+00> : vector<8xf32>
    %128 = vector.multi_reduction <add>, %127, %cst_112 [1] : vector<8x648xf32> to vector<8xf32>
    %129 = vector.shape_cast %128 : vector<8xf32> to vector<8x1xf32>
    %cst_113 = arith.constant 0.001953125 : f32
    %130 = vector.broadcast %cst_113 : f32 to vector<8x1xf32>
    %131 = arith.mulf %129, %130 : vector<8x1xf32>
    %132 = arith.mulf %127, %127 : vector<8x648xf32>
    %cst_114 = arith.constant dense<0.000000e+00> : vector<8xf32>
    %133 = vector.multi_reduction <add>, %132, %cst_114 [1] : vector<8x648xf32> to vector<8xf32>
    %134 = vector.shape_cast %133 : vector<8xf32> to vector<8x1xf32>
    %cst_115 = arith.constant 0.001953125 : f32
    %135 = vector.broadcast %cst_115 : f32 to vector<8x1xf32>
    %136 = arith.mulf %134, %135 : vector<8x1xf32>
    %137 = arith.mulf %131, %131 : vector<8x1xf32>
    %138 = arith.subf %136, %137 : vector<8x1xf32>
    %cst_116 = arith.constant 9.99999974E-6 : f32
    %139 = vector.broadcast %cst_116 : f32 to vector<8x1xf32>
    %140 = arith.addf %138, %139 : vector<8x1xf32>
    %141 = math.rsqrt %140 : vector<8x1xf32>
    %142 = arith.mulf %141, %124 : vector<8x1xf32>
    %143 = arith.mulf %131, %142 : vector<8x1xf32>
    %144 = arith.subf %125, %143 : vector<8x1xf32>
    %145 = vector.broadcast %142 : vector<8x1xf32> to vector<8x648xf32>
    %146 = arith.mulf %123, %145 : vector<8x648xf32>
    %147 = vector.broadcast %144 : vector<8x1xf32> to vector<8x648xf32>
    %148 = arith.addf %146, %147 : vector<8x648xf32>
    %cst_117 = arith.constant 0.000000e+00 : f32
    %149 = vector.broadcast %cst_117 : f32 to vector<8x648xf32>
    %150 = arith.maximumf %148, %149 : vector<8x648xf32>
    %cst_118 = arith.constant 0.000000e+00 : f32
    %151 = vector.broadcast %cst_118 : f32 to vector<8x20xf32>
    %c0_119 = arith.constant 0 : index
    %c648 = arith.constant 648 : index
    %152 = vector.load %arg11[%c0_119, %c648] : memref<8x668xf32, #tpu.memory_space<vmem>>, vector<8x20xf32>
    tpu.vector_store %arg11[%c0_119, %c648], %151 {strides = array<i32>} : memref<8x668xf32, #tpu.memory_space<vmem>>, vector<8x20xf32>,
    %c0_120 = arith.constant 0 : index
    %c0_121 = arith.constant 0 : index
    %153 = vector.load %arg11[%c0_120, %c0_121] : memref<8x668xf32, #tpu.memory_space<vmem>>, vector<8x648xf32>
    tpu.vector_store %arg11[%c0_120, %c0_121], %150 {strides = array<i32>} : memref<8x668xf32, #tpu.memory_space<vmem>>, vector<8x648xf32>,
    %c0_122 = arith.constant 0 : index
    %c1_123 = arith.constant 1 : index
    %154 = vector.load %arg11[%c0_122, %c1_123] : memref<8x668xf32, #tpu.memory_space<vmem>>, vector<8x648xf32>
    %155 = arith.maximumf %150, %154 : vector<8x648xf32>
    %c0_124 = arith.constant 0 : index
    %c18 = arith.constant 18 : index
    %156 = vector.load %arg11[%c0_124, %c18] : memref<8x668xf32, #tpu.memory_space<vmem>>, vector<8x648xf32>
    %157 = arith.maximumf %155, %156 : vector<8x648xf32>
    %c0_125 = arith.constant 0 : index
    %c19 = arith.constant 19 : index
    %158 = vector.load %arg11[%c0_125, %c19] : memref<8x668xf32, #tpu.memory_space<vmem>>, vector<8x648xf32>
    %159 = arith.maximumf %157, %158 : vector<8x648xf32>
    %c0_126 = arith.constant 0 : index
    %c0_127 = arith.constant 0 : index
    %160 = vector.load %arg9[%c0_126, %c0_127] : memref<8x648xf32, #tpu.memory_space<vmem>>, vector<8x648xf32>
    tpu.vector_store %arg9[%c0_126, %c0_127], %159 {strides = array<i32>} : memref<8x648xf32, #tpu.memory_space<vmem>>, vector<8x648xf32>,
    return
  }
  func.func @transform_0(%arg0: i32) -> (i32, i32) {
    %c0_i32 = arith.constant 0 : i32
    %c0_i32_0 = arith.constant 0 : i32
    %c0_i32_1 = arith.constant 0 : i32
    return %c0_i32, %c0_i32_0 : i32, i32
  }
  func.func @transform_1(%arg0: i32) -> (i32, i32, i32) {
    %c0_i32 = arith.constant 0 : i32
    %c0_i32_0 = arith.constant 0 : i32
    %c0_i32_1 = arith.constant 0 : i32
    %c0_i32_2 = arith.constant 0 : i32
    return %c0_i32, %c0_i32_0, %c0_i32_1 : i32, i32, i32
  }
  func.func @transform_2(%arg0: i32) -> (i32, i32) {
    %c0_i32 = arith.constant 0 : i32
    %c0_i32_0 = arith.constant 0 : i32
    %c0_i32_1 = arith.constant 0 : i32
    return %c0_i32, %c0_i32_0 : i32, i32
  }
  func.func @transform_3(%arg0: i32) -> (i32, i32) {
    %c0_i32 = arith.constant 0 : i32
    %c0_i32_0 = arith.constant 0 : i32
    %c0_i32_1 = arith.constant 0 : i32
    return %c0_i32, %c0_i32_0 : i32, i32
  }
  func.func @transform_4(%arg0: i32) -> (i32, i32, i32) {
    %c0_i32 = arith.constant 0 : i32
    %c0_i32_0 = arith.constant 0 : i32
    %c0_i32_1 = arith.constant 0 : i32
    %c0_i32_2 = arith.constant 0 : i32
    return %c0_i32, %c0_i32_0, %c0_i32_1 : i32, i32, i32
  }
  func.func @transform_5(%arg0: i32) -> (i32, i32) {
    %c0_i32 = arith.constant 0 : i32
    %c0_i32_0 = arith.constant 0 : i32
    %c0_i32_1 = arith.constant 0 : i32
    return %c0_i32, %c0_i32_0 : i32, i32
  }
  func.func @transform_6(%arg0: i32) -> (i32, i32) {
    %c0_i32 = arith.constant 0 : i32
    %c0_i32_0 = arith.constant 0 : i32
    %c0_i32_1 = arith.constant 0 : i32
    return %c0_i32, %c0_i32_0 : i32, i32
  }
  func.func @transform_7(%arg0: i32) -> (i32, i32) {
    %c0_i32 = arith.constant 0 : i32
    %c0_i32_0 = arith.constant 0 : i32
    %c0_i32_1 = arith.constant 0 : i32
    return %c0_i32, %c0_i32_0 : i32, i32
  }
  func.func @transform_8(%arg0: i32) -> (i32, i32) {
    %c0_i32 = arith.constant 0 : i32
    %c0_i32_0 = arith.constant 0 : i32
    %c0_i32_1 = arith.constant 0 : i32
    return %c0_i32, %c0_i32_0 : i32, i32
  }
}

</mosaic_0001>

<bundles_post_ra>
// kernel: tile.6
= control target key start
LH: loop header
LB: loop body
LE: loop exit
PB: predicated region body
PF: predicated region fallthrough
CT: control target
= control target key end

     0   :  { %s46_s0 = inlined_call_operand.vmem [shape: f32[324], index: 0, kind: input, shape index: {}]   ;;  %s47_s1 = inlined_call_operand.vmem [shape: f32[2,324], index: 1, kind: output, shape index: {}]  }
   0x1   :  { %v4_v0 = vld [vmem:[%s46_s0] ss:$0 sm:$0xff]  ;;  %v14_v1 = vld [vmem:[%s46_s0 + $0x1] ss:$0 sm:$0xff]  ;;  %v16_v2 = vld [vmem:[%s46_s0 + $0x2] ss:$0 sm:$0xff] }
   0x2   :  { %5 = vst [vmem:[%s47_s1] sm:$0x3] %v4_v0  ;;  %15 = vst [vmem:[%s47_s1 + $0x2] sm:$0x3] %v14_v1 }
   0x3   :  { %17 = vst [vmem:[%s47_s1 + $0x4] sm:$0x3] %v16_v2 }

// kernel: tile.7
= control target key start
LH: loop header
LB: loop body
LE: loop exit
PB: predicated region body
PF: predicated region fallthrough
CT: control target
= control target key end

     0   :  { %vm30_vm0 = vcmask 1042434   ;;  %s20_s12 = smov 3  ;;  %vm32_vm1 = vcmask 490496   ;;  %vm17_vm2 = vcmask 556032   ;;  %s45_s13 = smov 3  ;;  %vm36_vm3 = vcmask 64512   ;;  %s140_s0 = inlined_call_operand.vmem [shape: f32[2,324], index: 0, kind: input, shape index: {}]   ;;  %s141_s1 = inlined_call_operand.vmem [shape: f32[1,648], index: 1, kind: output, shape index: {}]  }
   0x1   :  { %v92_v0 = vld [vmem:[%s140_s0 + $0x4] sm:$0x3]  ;;  %v93_v1 = vld [vmem:[%s140_s0 + $0x2] sm:$0x3]  ;;  %v13_v2 = vld [vmem:[%s140_s0] sm:$0x3] }
   0x2   :  { %8 = vst [vmem:[#allocation1 + $0x10] sm:$0x3] %v92_v0  ;;  %12 = vst [vmem:[#allocation1 + $0x8] sm:$0x3] %v93_v1  ;;  %s26_s0 = smov 3  ;;  %s100_s14 = smov 68  }
   0x3   :  { %14 = vst [vmem:[#allocation1] sm:$0x3] %v13_v2  ;;  %vm39_vm4 = vcmask 1048096  }
   0x9   :  { %v24_v3 = vld [vmem:[#allocation1 + $0x11] sm:$0x1]   ;;  %v29_v5 = vld [vmem:[#allocation1 + $0x7] sm:$0x4]   ;;  %v16_v8 = vld [vmem:[#allocation1 + $0x10] sm:$0x1]  }
   0xa   :  { %v27_v4 = vld [vmem:[#allocation1 + $0x11] ss:$-16 sm:%s26_s0]   ;;  %v21_v7 = vld [vmem:[#allocation1] ss:$8 sm:%s20_s12]   ;;  %19 = vst.msk [vmem:[#allocation0 + $0x10] sm:$0x1] %vm17_vm2, %v16_v8  }
   0xb   :  { %v31_v6 = vsel %vm30_vm0, %v29_v5, %v27_v4  ;;  %22 = vst [vmem:[#allocation0] ss:$8 sm:$0x3] %v21_v7   ;;  %v46_v10 = vld [vmem:[#allocation1 + $0x9] ss:$-8 sm:%s45_s13]  }
   0xc   :  { %v33_v9 = vsel %vm32_vm1, %v31_v6, %v24_v3 }
   0xd   :  { %34 = vrot.lane.b32.xlu0 %v33_v9, %s100_s14 }
  0x11   :  { %47 = vrot.lane.b32.xlu0 %v46_v10, %s100_s14 }
  0x12   :  { %v55_v11 = vld [vmem:[#allocation0] sm:$0x1]  ;;  %v59_v12 = vld [vmem:[#allocation0 + $0x8] sm:$0x1] }
  0x13   :  { %57 = vst [vmem:[%s141_s1] sm:$0x1] %v55_v11  ;;  %94 = vst [vmem:[%s141_s1 + $0x1] sm:$0x1] %v59_v12 }
  0x7f   :  { %v35_v13 = vpop.permute.xlu0 %34  }
  0x80   :  { %38 = vst.msk [vmem:[#allocation0 + $0x28] sm:$0x1] %vm36_vm3, %v35_v13  }
  0x81   :  { %41 = vst.msk [vmem:[#allocation0 + $0x20] ss:$-16 sm:$0x3] %vm39_vm4, %v35_v13   ;;  %43 = vst.msk [vmem:[#allocation0 + $0x16] sm:$0x4] %vm39_vm4, %v35_v13  }
  0x83   :  { %v48_v14 = vpop.permute.xlu0 %47  }
  0x84   :  { %51 = vst.msk [vmem:[#allocation0 + $0x20] ss:$-8 sm:$0x3] %vm17_vm2, %v48_v14  }
  0x87   :  { %v82_v16 = vld [vmem:[#allocation0 + $0x28] sm:$0x1] }
  0x88   :  { %v64_v15 = vld [vmem:[#allocation0 + $0x10] sm:$0x1]  ;;  %98 = vst [vmem:[%s141_s1 + $0x5] sm:$0x1] %v82_v16 }
  0x89   :  { %95 = vst [vmem:[%s141_s1 + $0x2] sm:$0x1] %v64_v15 }
  0x8b   :  { %v70_v17 = vld [vmem:[#allocation0 + $0x18] sm:$0x1]  ;;  %v76_v18 = vld [vmem:[#allocation0 + $0x20] sm:$0x1] }
  0x8c   :  { %96 = vst [vmem:[%s141_s1 + $0x3] sm:$0x1] %v70_v17  ;;  %97 = vst [vmem:[%s141_s1 + $0x4] sm:$0x1] %v76_v18 }

// kernel: vgg_block_forward.1
= control target key start
LH: loop header
LB: loop body
LE: loop exit
PB: predicated region body
PF: predicated region fallthrough
CT: control target
= control target key end

     0   :  { %v42_v0 = vlaneseq  ;;  %v4034_v2 = vmov 1983009808   ;;  %v4035_v7 = vmov 0   ;;  %s4036_s29 = smov 18   ;;  %s4037_s10 = smov 19   ;;  %vm75_vm0 = vcmask 146432   ;;  %s4783_s0 = inlined_call_operand.vmem [shape: bf16[4,904], index: 0, kind: input, shape index: {}]   ;;  %s4784_s1 = inlined_call_operand.vmem [shape: bf16[9,8,4], index: 1, kind: input, shape index: {}]   ;;  %s4785_s7 = inlined_call_operand.vmem [shape: f32[1,648], index: 7, kind: input, shape index: {}]   ;;  %s4786_s2 = inlined_call_operand.vmem [shape: f32[8,1], index: 2, kind: input, shape index: {}]   ;;  %s4787_s3 = inlined_call_operand.vmem [shape: f32[8,1], index: 3, kind: input, shape index: {}]   ;;  %s4788_s4 = inlined_call_operand.vmem [shape: bf16[9,8,8], index: 4, kind: input, shape index: {}]   ;;  %s4789_s5 = inlined_call_operand.vmem [shape: f32[8,1], index: 5, kind: input, shape index: {}]   ;;  %s4790_s6 = inlined_call_operand.vmem [shape: f32[8,1], index: 6, kind: input, shape index: {}]   ;;  %s4791_s8 = inlined_call_operand.vmem [shape: f32[8,648], index: 8, kind: output, shape index: {}]  }
   0x1   :  { %v32_v1 = vld [vmem:[%s4783_s0] sm:$0xff]  ;;  %v40_v3 = vunpack.c.l.s4 %v4034_v2  ;;  %136 = vmatprep.mubr.bf16.mxu0 %v4035_v7  ;;  %1880 = vst [vmem:[#allocation2] sm:$0xf] %v4035_v7  ;;  %4012 = vset.pattern.permute.xlu0 %v4035_v7  ;;  %s4038_s11 = smov 17   ;;  %v591_v15 = vld [vmem:[%s4783_s0 + $0x8] sm:$0x3f] }
   0x2   :  { %v4093_v4 = vshrl.u32 %v42_v0, 7  ;;  %v38_v6 = vcombine.high %v32_v1, %v32_v1  ;;  %4013 = vset.pattern.permute.xlu1 %v4035_v7  ;;  %2005 = vmatprep.mubr.bf16.mxu1 %v4035_v7  ;;  %v3654_v13 = vld.sshfl [vmem:[%s4783_s0 + $0x8] sm:$0x33 pattern:$0x76325410]  ;;  %s4039_s14 = smov 1   ;;  %v611_v18 = vcombine.high %v591_v15, %v591_v15 }
   0x3   :  { %v41_v5 = vunpack.c.0.s8 %v40_v3  ;;  %v62_v14 = vcombine.high %v3654_v13, %v3654_v13  ;;  %v981_v19 = vld [vmem:[%s4783_s0 + $0x2] sm:$0xff]  ;;  %s4040_s17 = smov 127   ;;  %v4156_v26 = vld.sshfl [vmem:[%s4783_s0 + $0xa] sm:$0x33 pattern:$0x76325410] }
   0x4   :  { %v985_v22 = vcombine.high %v981_v19, %v981_v19  ;;  %v4162_v27 = vcombine.high %v4156_v26, %v4156_v26  ;;  %s4041_s20 = smov 111   ;;  %s4042_s0 = smov 110   ;;  %vm85_vm1 = vcmask 1041408   ;;  %v3653_v36 = vld [vmem:[%s4784_s1 + $0x4] sm:$0xf]  ;;  %vm81_vm2 = vcmask 31744  }
   0x5   :  { %v44_v8 = vsub.s32 %v41_v5, %v4093_v4  ;;  %s4043_s21 = smov 109   ;;  %vm239_vm3 = vcmask 154624   ;;  %v31_v53 = vld [vmem:[%s4784_s1] sm:$0xf]  ;;  %vm432_vm4 = vcmask 138240   ;;  %vm641_vm5 = vcmask 7168  }
   0x6   :  { %v3667_v5 = vld [vmem:[%s4784_s1 + $0x8] sm:$0xf]  ;;  %vm1022_vm6 = vcmask 1039360   ;;  %vm1221_vm7 = vcmask 908288   ;;  %vm1420_vm8 = vcmask 900096   ;;  %vm1619_vm9 = vcmask 891904  }
   0x7   :  { %v45_v9 = vrot.slane %v32_v1, %v44_v8  ;;  %v52_v10 = vrot.slane %v38_v6, %v44_v8  ;;  %v618_v16 = vrot.slane %v591_v15, %v44_v8  ;;  %v625_v20 = vrot.slane %v611_v18, %v44_v8 }
   0x8   :  { %v4134_v21 = vrot.slane %v981_v19, %v44_v8  ;;  %v4143_v24 = vrot.slane %v985_v22, %v44_v8  ;;  %vm1818_vm10 = vcmask 64512   ;;  %vm1881_vm11 = vcmask 1043520  }
   0x9   :  { %63 = vrot.lane.b32.xlu0 %v45_v9, %s4036_s29  ;;  %67 = vrot.lane.b32.xlu1 %v52_v10, %s4036_s29  ;;  %v53_v11 = vcombine.high %v45_v9, %v45_v9  ;;  %v54_v12 = vcombine.high %v52_v10, %v52_v10  ;;  %v626_v17 = vcombine.high %v618_v16, %v618_v16  ;;  %vm1882_vm12 = vcmask 64516  }
   0xa   :  { %v4141_v23 = vcombine.high %v4134_v21, %v4134_v21  ;;  %v4151_v25 = vcombine.high %v4143_v24, %v4143_v24  ;;  %vm1883_vm13 = vmor %vm1882_vm12, %vm1881_vm11  ;;  %vm1911_vm14 = vcmask 1043456  }
   0xb   :  { %1884 = vst.msk [vmem:[#allocation2 + $0x18] sm:$0xff] %vm1883_vm13, %v4035_v7  ;;  %vm1912_vm15 = vmor %vm1882_vm12, %vm1911_vm14 }
   0xd   :  { %65 = vrot.lane.b32.xlu0 %v53_v11, %s4036_s29  ;;  %69 = vrot.lane.b32.xlu1 %v54_v12, %s4036_s29 }
  0x11   :  { %71 = vrot.lane.b32.xlu0 %v3654_v13, %s4036_s29  ;;  %73 = vrot.lane.b32.xlu1 %v62_v14, %s4036_s29 }
  0x15   :  { %227 = vrot.lane.b32.xlu0 %v45_v9, %s4037_s10  ;;  %229 = vrot.lane.b32.xlu1 %v53_v11, %s4037_s10 }
  0x19   :  { %231 = vrot.lane.b32.xlu0 %v52_v10, %s4037_s10  ;;  %233 = vrot.lane.b32.xlu1 %v54_v12, %s4037_s10 }
  0x1d   :  { %235 = vrot.lane.b32.xlu0 %v3654_v13, %s4037_s10  ;;  %237 = vrot.lane.b32.xlu1 %v62_v14, %s4037_s10 }
  0x21   :  { %420 = vrot.lane.b32.xlu0 %v45_v9, %s4038_s11  ;;  %422 = vrot.lane.b32.xlu1 %v53_v11, %s4038_s11 }
  0x25   :  { %424 = vrot.lane.b32.xlu0 %v52_v10, %s4038_s11  ;;  %426 = vrot.lane.b32.xlu1 %v54_v12, %s4038_s11 }
  0x29   :  { %428 = vrot.lane.b32.xlu0 %v3654_v13, %s4038_s11  ;;  %430 = vrot.lane.b32.xlu1 %v62_v14, %s4038_s11 }
  0x2d   :  { %627 = vrot.lane.b32.xlu0 %v45_v9, %s4039_s14  ;;  %629 = vrot.lane.b32.xlu1 %v53_v11, %s4039_s14 }
  0x31   :  { %631 = vrot.lane.b32.xlu0 %v52_v10, %s4039_s14  ;;  %633 = vrot.lane.b32.xlu1 %v54_v12, %s4039_s14 }
  0x35   :  { %635 = vrot.lane.b32.xlu0 %v618_v16, %s4039_s14  ;;  %637 = vrot.lane.b32.xlu1 %v626_v17, %s4039_s14 }
  0x39   :  { %639 = vrot.lane.b32.xlu0 %v625_v20, %s4039_s14  ;;  %1010 = vrot.lane.b32.xlu1 %v4134_v21, %s4040_s17 }
  0x3d   :  { %1012 = vrot.lane.b32.xlu0 %v4141_v23, %s4040_s17  ;;  %1014 = vrot.lane.b32.xlu1 %v4143_v24, %s4040_s17 }
  0x41   :  { %1016 = vrot.lane.b32.xlu0 %v4151_v25, %s4040_s17  ;;  %1018 = vrot.lane.b32.xlu1 %v4156_v26, %s4040_s17 }
  0x45   :  { %1020 = vrot.lane.b32.xlu0 %v4162_v27, %s4040_s17  ;;  %1209 = vrot.lane.b32.xlu1 %v4134_v21, %s4041_s20 }
  0x49   :  { %1211 = vrot.lane.b32.xlu0 %v4141_v23, %s4041_s20  ;;  %1213 = vrot.lane.b32.xlu1 %v4143_v24, %s4041_s20 }
  0x4d   :  { %1215 = vrot.lane.b32.xlu0 %v4151_v25, %s4041_s20  ;;  %1217 = vrot.lane.b32.xlu1 %v4156_v26, %s4041_s20 }
  0x51   :  { %1219 = vrot.lane.b32.xlu0 %v4162_v27, %s4041_s20  ;;  %1408 = vrot.lane.b32.xlu1 %v4134_v21, %s4042_s0 }
  0x55   :  { %1410 = vrot.lane.b32.xlu0 %v4141_v23, %s4042_s0  ;;  %1412 = vrot.lane.b32.xlu1 %v4143_v24, %s4042_s0 }
  0x59   :  { %1414 = vrot.lane.b32.xlu0 %v4151_v25, %s4042_s0  ;;  %1416 = vrot.lane.b32.xlu1 %v4156_v26, %s4042_s0 }
  0x5d   :  { %1418 = vrot.lane.b32.xlu0 %v4162_v27, %s4042_s0  ;;  %1607 = vrot.lane.b32.xlu1 %v4134_v21, %s4043_s21 }
  0x61   :  { %1609 = vrot.lane.b32.xlu0 %v4141_v23, %s4043_s21  ;;  %1611 = vrot.lane.b32.xlu1 %v4143_v24, %s4043_s21 }
  0x65   :  { %1613 = vrot.lane.b32.xlu0 %v4151_v25, %s4043_s21  ;;  %1615 = vrot.lane.b32.xlu1 %v4156_v26, %s4043_s21 }
  0x69   :  { %1617 = vrot.lane.b32.xlu0 %v4162_v27, %s4043_s21 }
  0x7b   :  { %v64_v28 = vpop.permute.xlu0 %63  ;;  %v68_v29 = vpop.permute.xlu1 %67 }
  0x7f   :  { %v66_v30 = vpop.permute.xlu0 %65  ;;  %v70_v31 = vpop.permute.xlu1 %69 }
  0x80   :  { %v77_v32 = vsel %vm75_vm0, %v66_v30, %v68_v29  ;;  %v76_v33 = vsel %vm75_vm0, %v64_v28, %v66_v30  ;;  %v78_v35 = vsel %vm75_vm0, %v68_v29, %v70_v31  ;;  %v3675_v28 = vld [vmem:[%s4784_s1 + $0xc] sm:$0xf] }
  0x81   :  { %3655 = vmatprep.subr.msk.bf16.mxu0 %vm85_vm1, %v77_v32  ;;  %v87_v34 = vsel %vm85_vm1, %v76_v33, 0  ;;  %v93_v39 = vsel %vm85_vm1, %v78_v35, 0  ;;  %v3682_v35 = vld [vmem:[%s4784_s1 + $0x10] sm:$0xf] }
  0x82   :  { %105 = vmatpush1.bf16.msra.mxu0 %v87_v34  ;;  %v833_v34 = vsel %vm85_vm1, %v4134_v21, 0 }
  0x83   :  { %v72_v37 = vpop.permute.xlu0 %71  ;;  %v74_v40 = vpop.permute.xlu1 %73 }
  0x84   :  { %v79_v38 = vsel %vm75_vm0, %v70_v31, %v72_v37  ;;  %v80_v43 = vsel %vm75_vm0, %v72_v37, %v74_v40 }
  0x85   :  { %3656 = vmatmul.mubr.msk.bf16.vlgmr.msra.gmra.mrb[0].mxu0 %vm81_vm2, %v3653_v36  ;;  %3657 = vmatprep.subr.msk.bf16.mxu0 %vm85_vm1, %v79_v38  ;;  %v99_v46 = vsel %vm85_vm1, %v80_v43, 0 }
  0x86   :  { %146 = vmatpush1.bf16.msra.mxu0 %v93_v39  ;;  %177 = vmatprep.mubr.bf16.mxu0 %v4035_v7 }
  0x87   :  { %3659 = vmatprep.subr.msk.bf16.mxu0 %vm85_vm1, %v74_v40  ;;  %v228_v41 = vpop.permute.xlu0 %227  ;;  %v230_v42 = vpop.permute.xlu1 %229 }
  0x88   :  { %v240_v47 = vsel %vm239_vm3, %v228_v41, %v230_v42 }
  0x89   :  { %v249_v49 = vsel %vm85_vm1, %v240_v47, 0 }
  0x8b   :  { %v232_v44 = vpop.permute.xlu0 %231  ;;  %v234_v50 = vpop.permute.xlu1 %233 }
  0x8c   :  { %v241_v45 = vsel %vm239_vm3, %v230_v42, %v232_v44  ;;  %v242_v52 = vsel %vm239_vm3, %v232_v44, %v234_v50  ;;  %v3690_v42 = vld [vmem:[%s4784_s1 + $0x14] sm:$0xf] }
  0x8d   :  { %3658 = vmatmul.mubr.msk.bf16.vlgmr.msra.gmra.mrb[4].mxu0 %vm81_vm2, %v3653_v36  ;;  %v255_v55 = vsel %vm85_vm1, %v242_v52, 0 }
  0x8e   :  { %187 = vmatpush1.bf16.msra.mxu0 %v99_v46  ;;  %218 = vmatprep.mubr.bf16.mxu0 %v4035_v7 }
  0x8f   :  { %3661 = vmatprep.subr.msk.bf16.mxu0 %vm85_vm1, %v241_v45  ;;  %v236_v48 = vpop.permute.xlu0 %235  ;;  %v238_v56 = vpop.permute.xlu1 %237 }
  0x90   :  { %v243_v51 = vsel %vm239_vm3, %v234_v50, %v236_v48  ;;  %v244_v59 = vsel %vm239_vm3, %v236_v48, %v238_v56 }
  0x91   :  { %v261_v61 = vsel %vm85_vm1, %v244_v59, 0 }
  0x93   :  { %v421_v54 = vpop.permute.xlu0 %420  ;;  %v423_v58 = vpop.permute.xlu1 %422 }
  0x94   :  { %v433_v62 = vsel %vm432_vm4, %v421_v54, %v423_v58 }
  0x95   :  { %3660 = vmatmul.mubr.msk.bf16.vlgmr.msra.gmra.mrb[8].mxu0 %vm81_vm2, %v3653_v36  ;;  %v442_v0 = vsel %vm85_vm1, %v433_v62, 0  ;;  %v839_v36 = vsel %vm85_vm1, %v4143_v24, 0 }
  0x96   :  { %267 = vmatpush1.bf16.msra.mxu0 %v249_v49  ;;  %298 = vmatprep.mubr.bf16.mxu0 %v4035_v7 }
  0x97   :  { %3663 = vmatprep.subr.msk.bf16.mxu0 %vm85_vm1, %v243_v51  ;;  %v425_v57 = vpop.permute.xlu0 %424  ;;  %v427_v1 = vpop.permute.xlu1 %426 }
  0x98   :  { %v434_v60 = vsel %vm432_vm4, %v423_v58, %v425_v57  ;;  %v435_v3 = vsel %vm432_vm4, %v425_v57, %v427_v1  ;;  %v3698_v57 = vld [vmem:[%s4784_s1 + $0x18] sm:$0xf] }
  0x99   :  { %v448_v8 = vsel %vm85_vm1, %v435_v3, 0 }
  0x9b   :  { %v429_v63 = vpop.permute.xlu0 %428  ;;  %v431_v9 = vpop.permute.xlu1 %430 }
  0x9c   :  { %v436_v2 = vsel %vm432_vm4, %v427_v1, %v429_v63  ;;  %v437_v12 = vsel %vm432_vm4, %v429_v63, %v431_v9 }
  0x9d   :  { %3662 = vmatmul.mubr.msk.bf16.vlgmr.msra.gmra.mrb[0].mxu0 %vm81_vm2, %v31_v53  ;;  %v454_v14 = vsel %vm85_vm1, %v437_v12, 0 }
  0x9e   :  { %308 = vmatpush1.bf16.msra.mxu0 %v255_v55  ;;  %339 = vmatprep.mubr.bf16.mxu0 %v4035_v7 }
  0x9f   :  { %3665 = vmatprep.subr.msk.bf16.mxu0 %vm85_vm1, %v238_v56  ;;  %v628_v6 = vpop.permute.xlu0 %627  ;;  %v630_v11 = vpop.permute.xlu1 %629 }
  0xa0   :  { %v642_v15 = vsel %vm641_vm5, %v628_v6, %v630_v11 }
  0xa1   :  { %v652_v17 = vsel %vm85_vm1, %v642_v15, 0 }
  0xa3   :  { %v632_v10 = vpop.permute.xlu0 %631  ;;  %v634_v18 = vpop.permute.xlu1 %633 }
  0xa4   :  { %v643_v13 = vsel %vm641_vm5, %v630_v11, %v632_v10  ;;  %v644_v22 = vsel %vm641_vm5, %v632_v10, %v634_v18  ;;  %v3706_v10 = vld [vmem:[%s4784_s1 + $0x1c] sm:$0xf] }
  0xa5   :  { %3664 = vmatmul.mubr.msk.bf16.vlgmr.msra.gmra.mrb[4].mxu0 %vm81_vm2, %v31_v53  ;;  %v658_v31 = vsel %vm85_vm1, %v644_v22, 0 }
  0xa6   :  { %349 = vmatpush1.bf16.msra.mxu0 %v261_v61  ;;  %380 = vmatprep.mubr.bf16.mxu0 %v4035_v7 }
  0xa7   :  { %3669 = vmatprep.subr.msk.bf16.mxu0 %vm85_vm1, %v434_v60  ;;  %v636_v16 = vpop.permute.xlu0 %635  ;;  %v638_v29 = vpop.permute.xlu1 %637 }
  0xa8   :  { %v645_v19 = vsel %vm641_vm5, %v634_v18, %v636_v16  ;;  %v646_v32 = vsel %vm641_vm5, %v636_v16, %v638_v29 }
  0xa9   :  { %v664_v33 = vsel %vm85_vm1, %v646_v32, 0 }
  0xab   :  { %v640_v20 = vpop.permute.xlu0 %639  ;;  %v1011_v37 = vpop.permute.xlu1 %1010 }
  0xac   :  { %v647_v30 = vsel %vm641_vm5, %v638_v29, %v640_v20 }
  0xad   :  { %3666 = vmatmul.mubr.msk.bf16.vlgmr.msra.gmra.mrb[8].mxu0 %vm81_vm2, %v31_v53 }
  0xae   :  { %460 = vmatpush1.bf16.msra.mxu0 %v442_v0  ;;  %491 = vmatprep.mubr.bf16.mxu0 %v4035_v7 }
  0xaf   :  { %3671 = vmatprep.subr.msk.bf16.mxu0 %vm85_vm1, %v436_v2  ;;  %v1013_v21 = vpop.permute.xlu0 %1012 }
  0xb0   :  { %v1023_v24 = vsel %vm1022_vm6, %v1011_v37, %v1013_v21  ;;  %v30_v37 = vld [vmem:[%s4785_s7] sm:$0x3f] }
  0xb3   :  { %v1017_v40 = vpop.permute.xlu0 %1016 }
  0xb5   :  { %3670 = vmatmul.mubr.msk.bf16.vlgmr.msra.gmra.mrb[0].mxu0 %vm81_vm2, %v3667_v5 }
  0xb6   :  { %501 = vmatpush1.bf16.msra.mxu0 %v448_v8  ;;  %532 = vmatprep.mubr.bf16.mxu0 %v4035_v7 }
  0xb7   :  { %3673 = vmatprep.subr.msk.bf16.mxu0 %vm85_vm1, %v431_v9  ;;  %v1021_v45 = vpop.permute.xlu0 %1020 }
  0xbb   :  { %v1212_v46 = vpop.permute.xlu0 %1211 }
  0xbd   :  { %3672 = vmatmul.mubr.msk.bf16.vlgmr.msra.gmra.mrb[4].mxu0 %vm81_vm2, %v3667_v5 }
  0xbe   :  { %542 = vmatpush1.bf16.msra.mxu0 %v454_v14  ;;  %573 = vmatprep.mubr.bf16.mxu0 %v4035_v7 }
  0xbf   :  { %3676 = vmatprep.subr.msk.bf16.mxu0 %vm85_vm1, %v643_v13  ;;  %v1216_v54 = vpop.permute.xlu0 %1215 }
  0xc3   :  { %v1220_v60 = vpop.permute.xlu0 %1219 }
  0xc5   :  { %3674 = vmatmul.mubr.msk.bf16.vlgmr.msra.gmra.mrb[8].mxu0 %vm81_vm2, %v3667_v5 }
  0xc6   :  { %670 = vmatpush1.bf16.msra.mxu0 %v652_v17  ;;  %701 = vmatprep.mubr.bf16.mxu0 %v4035_v7 }
  0xc7   :  { %3678 = vmatprep.subr.msk.bf16.mxu0 %vm85_vm1, %v645_v19  ;;  %v1411_v61 = vpop.permute.xlu0 %1410 }
  0xcb   :  { %v1415_v6 = vpop.permute.xlu0 %1414 }
  0xcd   :  { %3677 = vmatmul.mubr.msk.bf16.vlgmr.msra.gmra.mrb[0].mxu0 %vm81_vm2, %v3675_v28 }
  0xce   :  { %711 = vmatpush1.bf16.msra.mxu0 %v658_v31  ;;  %742 = vmatprep.mubr.bf16.mxu0 %v4035_v7  ;;  %v3714_v31 = vld [vmem:[%s4784_s1 + $0x20] sm:$0xf] }
  0xcf   :  { %3680 = vmatprep.subr.msk.bf16.mxu0 %vm85_vm1, %v647_v30  ;;  %v1419_v13 = vpop.permute.xlu0 %1418 }
  0xd3   :  { %v1610_v14 = vpop.permute.xlu0 %1609 }
  0xd5   :  { %3679 = vmatmul.mubr.msk.bf16.vlgmr.msra.gmra.mrb[4].mxu0 %vm81_vm2, %v3675_v28 }
  0xd6   :  { %752 = vmatpush1.bf16.msra.mxu0 %v664_v33  ;;  %783 = vmatprep.mubr.bf16.mxu0 %v4035_v7 }
  0xd7   :  { %3684 = vmatprep.subr.msk.bf16.mxu0 %vm85_vm1, %v4141_v23  ;;  %v1015_v23 = vpop.permute.xlu1 %1014 }
  0xd8   :  { %v1024_v38 = vsel %vm1022_vm6, %v1013_v21, %v1015_v23  ;;  %v1784_v21 = vsub.s32 1, %v4093_v4 }
  0xdb   :  { %v1019_v39 = vpop.permute.xlu1 %1018 }
  0xdc   :  { %v1026_v41 = vsel %vm1022_vm6, %v1017_v40, %v1019_v39  ;;  %v1027_v48 = vsel %vm1022_vm6, %v1019_v39, %v1021_v45 }
  0xdd   :  { %3681 = vmatmul.mubr.msk.bf16.vlgmr.msra.gmra.mrb[8].mxu0 %vm81_vm2, %v3675_v28  ;;  %v1044_v50 = vsel %vm85_vm1, %v1027_v48, 0  ;;  %v1614_v28 = vpop.permute.xlu0 %1613 }
  0xde   :  { %851 = vmatpush1.bf16.msra.mxu0 %v833_v34  ;;  %882 = vmatprep.mubr.bf16.mxu0 %v4035_v7 }
  0xdf   :  { %3686 = vmatprep.subr.msk.bf16.mxu0 %vm85_vm1, %v4151_v25  ;;  %v845_v25 = vsel %vm85_vm1, %v4156_v26, 0  ;;  %v1025_v26 = vsel %vm1022_vm6, %v1015_v23, %v1017_v40  ;;  %v1210_v43 = vpop.permute.xlu1 %1209 }
  0xe0   :  { %v1038_v44 = vsel %vm85_vm1, %v1025_v26, 0  ;;  %v1222_v51 = vsel %vm1221_vm7, %v1210_v43, %v1212_v46  ;;  %v1792_v26 = vsub.s32 3, %v4093_v4 }
  0xe1   :  { %v1231_v53 = vsel %vm85_vm1, %v1222_v51, 0  ;;  %v1618_v33 = vpop.permute.xlu0 %1617 }
  0xe2   :  { %v4406_v48 = vrot.slane %v30_v37, %v1792_v26 }
  0xe3   :  { %v1214_v47 = vpop.permute.xlu1 %1213 }
  0xe4   :  { %v1223_v49 = vsel %vm1221_vm7, %v1212_v46, %v1214_v47  ;;  %v1224_v56 = vsel %vm1221_vm7, %v1214_v47, %v1216_v54 }
  0xe5   :  { %3685 = vmatmul.mubr.msk.bf16.vlgmr.msra.gmra.mrb[0].mxu0 %vm81_vm2, %v3682_v35  ;;  %v1237_v59 = vsel %vm85_vm1, %v1224_v56, 0 }
  0xe6   :  { %892 = vmatpush1.bf16.msra.mxu0 %v839_v36  ;;  %923 = vmatprep.mubr.bf16.mxu0 %v4035_v7  ;;  %v1780_v36 = vsub.s32 0, %v4093_v4 }
  0xe7   :  { %3688 = vmatprep.subr.msk.bf16.mxu0 %vm85_vm1, %v4162_v27  ;;  %v1032_v27 = vsel %vm85_vm1, %v1023_v24, 0  ;;  %v1218_v52 = vpop.permute.xlu1 %1217 }
  0xe8   :  { %v1225_v55 = vsel %vm1221_vm7, %v1216_v54, %v1218_v52  ;;  %v1226_v63 = vsel %vm1221_vm7, %v1218_v52, %v1220_v60  ;;  %v4390_v23 = vrot.slane %v30_v37, %v1780_v36  ;;  %v1796_v52 = vsub.s32 4, %v4093_v4 }
  0xe9   :  { %v1243_v1 = vsel %vm85_vm1, %v1226_v63, 0 }
  0xeb   :  { %v1409_v58 = vpop.permute.xlu1 %1408 }
  0xec   :  { %v1421_v2 = vsel %vm1420_vm8, %v1409_v58, %v1411_v61 }
  0xed   :  { %3687 = vmatmul.mubr.msk.bf16.vlgmr.msra.gmra.mrb[4].mxu0 %vm81_vm2, %v3682_v35  ;;  %v1430_v5 = vsel %vm85_vm1, %v1421_v2, 0 }
  0xee   :  { %933 = vmatpush1.bf16.msra.mxu0 %v845_v25  ;;  %964 = vmatprep.mubr.bf16.mxu0 %v4035_v7  ;;  %v4392_v25 = vrot.slane %v30_v37, %v1784_v21 }
  0xef   :  { %3692 = vmatprep.subr.msk.bf16.mxu0 %vm85_vm1, %v1024_v38  ;;  %v1413_v62 = vpop.permute.xlu1 %1412 }
  0xf0   :  { %v1422_v0 = vsel %vm1420_vm8, %v1411_v61, %v1413_v62  ;;  %v1423_v9 = vsel %vm1420_vm8, %v1413_v62, %v1415_v6  ;;  %v4412_v62 = vrot.slane %v30_v37, %v1796_v52 }
  0xf1   :  { %v1436_v12 = vsel %vm85_vm1, %v1423_v9, 0 }
  0xf3   :  { %v1417_v3 = vpop.permute.xlu1 %1416 }
  0xf4   :  { %v1424_v8 = vsel %vm1420_vm8, %v1415_v6, %v1417_v3  ;;  %v1425_v16 = vsel %vm1420_vm8, %v1417_v3, %v1419_v13 }
  0xf5   :  { %3689 = vmatmul.mubr.msk.bf16.vlgmr.msra.gmra.mrb[8].mxu0 %vm81_vm2, %v3682_v35  ;;  %v1442_v18 = vsel %vm85_vm1, %v1425_v16, 0 }
  0xf6   :  { %1050 = vmatpush1.bf16.msra.mxu0 %v1032_v27  ;;  %1081 = vmatprep.mubr.bf16.mxu0 %v4035_v7  ;;  %v1788_v27 = vsub.s32 2, %v4093_v4 }
  0xf7   :  { %3694 = vmatprep.subr.msk.bf16.mxu0 %vm85_vm1, %v1026_v41  ;;  %v1608_v11 = vpop.permute.xlu1 %1607 }
  0xf8   :  { %v1620_v19 = vsel %vm1619_vm9, %v1608_v11, %v1610_v14  ;;  %v4404_v46 = vrot.slane %v30_v37, %v1788_v27 }
  0xf9   :  { %v1629_v22 = vsel %vm85_vm1, %v1620_v19, 0 }
  0xfb   :  { %v1612_v15 = vpop.permute.xlu1 %1611 }
  0xfc   :  { %v1621_v17 = vsel %vm1619_vm9, %v1610_v14, %v1612_v15  ;;  %v1622_v30 = vsel %vm1619_vm9, %v1612_v15, %v1614_v28 }
  0xfd   :  { %3693 = vmatmul.mubr.msk.bf16.vlgmr.msra.gmra.mrb[0].mxu0 %vm81_vm2, %v3690_v42  ;;  %v1635_v32 = vsel %vm85_vm1, %v1622_v30, 0 }
  0xfe   :  { %1091 = vmatpush1.bf16.msra.mxu0 %v1038_v44  ;;  %1122 = vmatprep.mubr.bf16.mxu0 %v4035_v7 }
  0xff   :  { %3696 = vmatprep.subr.msk.bf16.mxu0 %vm85_vm1, %v1021_v45  ;;  %v1616_v20 = vpop.permute.xlu1 %1615 }
 0x100   :  { %v1623_v29 = vsel %vm1619_vm9, %v1614_v28, %v1616_v20  ;;  %v1624_v34 = vsel %vm1619_vm9, %v1616_v20, %v1618_v33 }
 0x101   :  { %v1641_v35 = vsel %vm85_vm1, %v1624_v34, 0 }
 0x105   :  { %3695 = vmatmul.mubr.msk.bf16.vlgmr.msra.gmra.mrb[4].mxu0 %vm81_vm2, %v3690_v42 }
 0x106   :  { %1132 = vmatpush1.bf16.msra.mxu0 %v1044_v50  ;;  %1163 = vmatprep.mubr.bf16.mxu0 %v4035_v7 }
 0x107   :  { %3700 = vmatprep.subr.msk.bf16.mxu0 %vm85_vm1, %v1223_v49 }
 0x10d   :  { %3697 = vmatmul.mubr.msk.bf16.vlgmr.msra.gmra.mrb[8].mxu0 %vm81_vm2, %v3690_v42 }
 0x10e   :  { %1249 = vmatpush1.bf16.msra.mxu0 %v1231_v53  ;;  %1280 = vmatprep.mubr.bf16.mxu0 %v4035_v7 }
 0x10f   :  { %3702 = vmatprep.subr.msk.bf16.mxu0 %vm85_vm1, %v1225_v55  ;;  %v1800_v55 = vsub.s32 5, %v4093_v4 }
 0x111   :  { %v4414_v63 = vrot.slane %v30_v37, %v1800_v55 }
 0x115   :  { %3701 = vmatmul.mubr.msk.bf16.vlgmr.msra.gmra.mrb[0].mxu0 %vm81_vm2, %v3698_v57 }
 0x116   :  { %1290 = vmatpush1.bf16.msra.mxu0 %v1237_v59  ;;  %1321 = vmatprep.mubr.bf16.mxu0 %v4035_v7 }
 0x117   :  { %3704 = vmatprep.subr.msk.bf16.mxu0 %vm85_vm1, %v1220_v60 }
 0x11d   :  { %3703 = vmatmul.mubr.msk.bf16.vlgmr.msra.gmra.mrb[4].mxu0 %vm81_vm2, %v3698_v57 }
 0x11e   :  { %1331 = vmatpush1.bf16.msra.mxu0 %v1243_v1  ;;  %1362 = vmatprep.mubr.bf16.mxu0 %v4035_v7 }
 0x11f   :  { %3708 = vmatprep.subr.msk.bf16.mxu0 %vm85_vm1, %v1422_v0 }
 0x125   :  { %3705 = vmatmul.mubr.msk.bf16.vlgmr.msra.gmra.mrb[8].mxu0 %vm81_vm2, %v3698_v57 }
 0x126   :  { %1448 = vmatpush1.bf16.msra.mxu0 %v1430_v5  ;;  %1479 = vmatprep.mubr.bf16.mxu0 %v4035_v7 }
 0x127   :  { %3710 = vmatprep.subr.msk.bf16.mxu0 %vm85_vm1, %v1424_v8 }
 0x12d   :  { %3709 = vmatmul.mubr.msk.bf16.vlgmr.msra.gmra.mrb[0].mxu0 %vm81_vm2, %v3706_v10 }
 0x12e   :  { %1489 = vmatpush1.bf16.msra.mxu0 %v1436_v12  ;;  %1520 = vmatprep.mubr.bf16.mxu0 %v4035_v7 }
 0x12f   :  { %3712 = vmatprep.subr.msk.bf16.mxu0 %vm85_vm1, %v1419_v13 }
 0x135   :  { %3711 = vmatmul.mubr.msk.bf16.vlgmr.msra.gmra.mrb[4].mxu0 %vm81_vm2, %v3706_v10 }
 0x136   :  { %1530 = vmatpush1.bf16.msra.mxu0 %v1442_v18  ;;  %1561 = vmatprep.mubr.bf16.mxu0 %v4035_v7 }
 0x137   :  { %3716 = vmatprep.subr.msk.bf16.mxu0 %vm85_vm1, %v1621_v17 }
 0x13d   :  { %3713 = vmatmul.mubr.msk.bf16.vlgmr.msra.gmra.mrb[8].mxu0 %vm81_vm2, %v3706_v10 }
 0x13e   :  { %1647 = vmatpush1.bf16.msra.mxu0 %v1629_v22  ;;  %1678 = vmatprep.mubr.bf16.mxu0 %v4035_v7 }
 0x13f   :  { %3718 = vmatprep.subr.msk.bf16.mxu0 %vm85_vm1, %v1623_v29  ;;  %v1775_v29 = vld [vmem:[%s4786_s2] sm:$0xff] }
 0x145   :  { %3717 = vmatmul.mubr.msk.bf16.vlgmr.msra.gmra.mrb[0].mxu0 %vm81_vm2, %v3714_v31 }
 0x146   :  { %1688 = vmatpush1.bf16.msra.mxu0 %v1635_v32  ;;  %1719 = vmatprep.mubr.bf16.mxu0 %v4035_v7  ;;  %v1776_v32 = vld [vmem:[%s4787_s3] sm:$0xff] }
 0x147   :  { %3720 = vmatprep.subr.msk.bf16.mxu0 %vm85_vm1, %v1618_v33 }
 0x14d   :  { %3719 = vmatmul.mubr.msk.bf16.vlgmr.msra.gmra.mrb[4].mxu0 %vm81_vm2, %v3714_v31 }
 0x14e   :  { %1729 = vmatpush1.bf16.msra.mxu0 %v1641_v35  ;;  %1760 = vmatprep.mubr.bf16.mxu0 %v4035_v7 }
 0x155   :  { %3721 = vmatmul.mubr.msk.bf16.vlgmr.msra.gmra.mrb[8].mxu0 %vm81_vm2, %v3714_v31 }
 0x218   :  { %v4394_v38 = vpop.f32.mrb[0].mxu0 }
 0x219   :  { %v1808_v24 = vmul.f32 %v4390_v23, %v4394_v38  ;;  %v4398_v39 = vpop.f32.mrb[1].mxu0 }
 0x21a   :  { %v1809_v40 = vmul.f32 %v4392_v25, %v4398_v39  ;;  %v1684_v41 = vpop.f32.mrb[2].mxu0 }
 0x21b   :  { %v1824_v42 = vmul.f32 %v1808_v24, %v1808_v24  ;;  %v1685_v43 = vpop.f32.mrb[3].mxu0 }
 0x21c   :  { %v1814_v44 = vadd.f32 %v1809_v40, %v1808_v24  ;;  %v1825_v45 = vmul.f32 %v1809_v40, %v1809_v40 }
 0x21e   :  { %v1830_v47 = vadd.f32 %v1825_v45, %v1824_v42 }
 0x220   :  { %v1721_v49 = vpop.f32.mrb[4].mxu0 }
 0x221   :  { %v1810_v50 = vmul.f32 %v4404_v46, %v1721_v49  ;;  %v1723_v51 = vpop.f32.mrb[5].mxu0 }
 0x222   :  { %v1811_v53 = vmul.f32 %v4406_v48, %v1723_v51  ;;  %v1725_v54 = vpop.f32.mrb[6].mxu0 }
 0x223   :  { %v1815_v56 = vadd.f32 %v1814_v44, %v1810_v50  ;;  %v1826_v57 = vmul.f32 %v1810_v50, %v1810_v50  ;;  %v1726_v58 = vpop.f32.mrb[7].mxu0 }
 0x224   :  { %v1827_v59 = vmul.f32 %v1811_v53, %v1811_v53 }
 0x225   :  { %v1831_v60 = vadd.f32 %v1830_v47, %v1826_v57  ;;  %v1816_v61 = vadd.f32 %v1815_v56, %v1811_v53 }
 0x227   :  { %v1832_v0 = vadd.f32 %v1831_v60, %v1827_v59 }
 0x228   :  { %v1762_v1 = vpop.f32.mrb[8].mxu0 }
 0x229   :  { %v1812_v2 = vmul.f32 %v4412_v62, %v1762_v1  ;;  %v1764_v3 = vpop.f32.mrb[9].mxu0 }
 0x22a   :  { %v1813_v5 = vmul.f32 %v4414_v63, %v1764_v3  ;;  %v1766_v6 = vpop.f32.mrb[10].mxu0 }
 0x22b   :  { %v1828_v4 = vmul.f32 %v1812_v2, %v1812_v2  ;;  %v1767_v8 = vpop.f32.mrb[11].mxu0  ;;  %v1817_v9 = vadd.f32 %v1816_v61, %v1812_v2 }
 0x22c   :  { %v1829_v10 = vmul.f32 %v1813_v5, %v1813_v5  ;;  %v1819_v11 = vsel %vm1818_vm10, %v1813_v5, 0.0 }
 0x22d   :  { %v1820_v12 = vadd.f32 %v1819_v11, %v1817_v9  ;;  %v1833_v13 = vadd.f32 %v1832_v0, %v1828_v4 }
 0x22e   :  { %v1834_v14 = vsel %vm1818_vm10, %v1829_v10, 0.0 }
 0x22f   :  { %1821 = vadd.xlane.f32.xlu1 %v1820_v12  ;;  %v1835_v15 = vadd.f32 %v1834_v14, %v1833_v13 }
 0x231   :  { %1836 = vadd.xlane.f32.xlu0 %v1835_v15 }
 0x2bc   :  { %v1822_v16 = vpop.xlane.xlu1 %1821 }
 0x2bd   :  { %v1823_v17 = vmul.f32 0.001953125, %v1822_v16 }
 0x2be   :  { %v1837_v18 = vpop.xlane.xlu0 %1836 }
 0x2bf   :  { %v1839_v19 = vmul.f32 %v1823_v17, %v1823_v17  ;;  %v1838_v20 = vmul.f32 0.001953125, %v1837_v18 }
 0x2c1   :  { %v1840_v22 = vsub.f32 %v1838_v20, %v1839_v19 }
 0x2c3   :  { %v1841_v28 = vadd.f32 1e-05, %v1840_v22 }
 0x2c5   :  { %4026 = vrsqrt.f32 %v1841_v28 }
 0x2cf   :  { %v4027_v30 = vpop.eup %4026 }
 0x2d0   :  { %v1843_v31 = vmul.f32 %v4027_v30, %v1775_v29  ;;  %v3725_v30 = vld [vmem:[%s4788_s4 + $0x4] sm:$0xf] }
 0x2d2   :  { %1848 = vperm.xlu0 %4012, %v1843_v31   ;;  %v1844_v33 = vmul.f32 %v1843_v31, %v1823_v17 }
 0x2d4   :  { %v1845_v34 = vsub.f32 %v1776_v32, %v1844_v33 }
 0x2d6   :  { %1859 = vperm.xlu1 %4013, %v1845_v34  }
 0x351   :  { %v1849_v35 = vpop.permute.xlu0 %1848 }
 0x352   :  { %v1851_v36 = vmul.f32 %v1849_v35, %v4394_v38  ;;  %v1852_v37 = vmul.f32 %v1849_v35, %v4398_v39  ;;  %v1853_v21 = vmul.f32 %v1849_v35, %v1721_v49  ;;  %v1854_v24 = vmul.f32 %v1849_v35, %v1723_v51 }
 0x353   :  { %v1855_v27 = vmul.f32 %v1849_v35, %v1762_v1  ;;  %v1856_v40 = vmul.f32 %v1849_v35, %v1764_v3 }
 0x355   :  { %v1860_v41 = vpop.permute.xlu1 %1859 }
 0x356   :  { %v1862_v26 = vadd.f32 %v1860_v41, %v1851_v36  ;;  %v1863_v42 = vadd.f32 %v1860_v41, %v1852_v37  ;;  %v1864_v43 = vadd.f32 %v1860_v41, %v1853_v21  ;;  %v1865_v44 = vadd.f32 %v1860_v41, %v1854_v24 }
 0x357   :  { %v1866_v45 = vadd.f32 %v1860_v41, %v1855_v27  ;;  %v1867_v47 = vadd.f32 %v1860_v41, %v1856_v40 }
 0x358   :  { %v1868_v50 = vmax.f32 %v1862_v26, 0.0  ;;  %v1869_v52 = vmax.f32 %v1863_v42, 0.0  ;;  %v1870_v53 = vmax.f32 %v1864_v43, 0.0  ;;  %v1871_v54 = vmax.f32 %v1865_v44, 0.0 }
 0x359   :  { %v1872_v55 = vmax.f32 %v1866_v45, 0.0  ;;  %v1873_v38 = vmax.f32 %v1867_v47, 0.0 }
 0x35a   :  { %v1874_v39 = vmul.f32 %v1868_v50, %v4390_v23  ;;  %v1875_v49 = vmul.f32 %v1869_v52, %v4392_v25  ;;  %v1876_v51 = vmul.f32 %v1870_v53, %v4404_v46  ;;  %v1877_v56 = vmul.f32 %v1871_v54, %v4406_v48  ;;  %v1914_v50 = vld [vmem:[%s4788_s4] sm:$0xf] }
 0x35b   :  { %v1878_v57 = vmul.f32 %v1872_v55, %v4412_v62  ;;  %v1879_v58 = vmul.f32 %v1873_v38, %v4414_v63 }
 0x35c   :  { %v3806_v59 = vpack.c.bf16 %v1875_v49, %v1874_v39  ;;  %v3807_v60 = vpack.c.bf16 %v1877_v56, %v1876_v51  ;;  %v4456_v10 = vpack.c.bf16 %v1874_v39, %v1874_v39  ;;  %v4461_v11 = vpack.c.bf16 %v1876_v51, %v1876_v51 }
 0x35d   :  { %v3808_v61 = vpack.c.bf16 %v1879_v58, %v1878_v57  ;;  %v4483_v15 = vpack.c.bf16 %v1875_v49, %v1875_v49  ;;  %v4489_v16 = vpack.c.bf16 %v1877_v56, %v1877_v56 }
 0x35e   :  { %1909 = vst [vmem:[#allocation2 + $0x4] sm:$0xff] %v3806_v59  ;;  %1910 = vst [vmem:[#allocation2 + $0xc] sm:$0xff] %v3807_v60 }
 0x35f   :  { %1913 = vst.msk [vmem:[#allocation2 + $0x14] sm:$0xff] %vm1912_vm15, %v3808_v61 }
 0x365   :  { %v1915_v0 = vld [vmem:[#allocation2] sm:$0xff]  ;;  %v1916_v3 = vld [vmem:[#allocation2 + $0x8] sm:$0xff] }
 0x366   :  { %v3727_v1 = vcombine.high %v1915_v0, %v1915_v0  ;;  %v3726_v2 = vcombine.low %v1915_v0, %v1915_v0  ;;  %v3729_v5 = vcombine.high %v1916_v3, %v1916_v3  ;;  %v1917_v6 = vld [vmem:[#allocation2 + $0x10] sm:$0xff]  ;;  %v3728_v8 = vcombine.low %v1916_v3, %v1916_v3  ;;  %v4024_v14 = vld [vmem:[#allocation2 + $0x18] ss:$0 sps:$4 sm:$0xff]   ;;  %v3744_v0 = vld [vmem:[%s4788_s4 + $0x8] sm:$0xf] }
 0x367   :  { %v3731_v4 = vcombine.high %v1917_v6, %v1917_v6  ;;  %v3730_v9 = vcombine.low %v1917_v6, %v1917_v6  ;;  %v2624_v12 = vld [vmem:[#allocation2 + $0x14] sm:$0xff] }
 0x368   :  { %2098 = vrot.lane.b32.xlu0 %v3727_v1, %s4037_s10  ;;  %1935 = vrot.lane.b32.xlu1 %v3726_v2, %s4036_s29  ;;  %v4466_v13 = vcombine.low %v2624_v12, %v2624_v12  ;;  %v4495_v17 = vcombine.high %v2624_v12, %v2624_v12 }
 0x36c   :  { %2102 = vrot.lane.b32.xlu0 %v3729_v5, %s4037_s10  ;;  %1937 = vrot.lane.b32.xlu1 %v3727_v1, %s4036_s29 }
 0x370   :  { %2106 = vrot.lane.b32.xlu0 %v3731_v4, %s4037_s10  ;;  %1939 = vrot.lane.b32.xlu1 %v3728_v8, %s4036_s29 }
 0x374   :  { %2261 = vrot.lane.b32.xlu0 %v3727_v1, %s4038_s11  ;;  %1941 = vrot.lane.b32.xlu1 %v3729_v5, %s4036_s29 }
 0x378   :  { %2265 = vrot.lane.b32.xlu0 %v3729_v5, %s4038_s11  ;;  %1943 = vrot.lane.b32.xlu1 %v3730_v9, %s4036_s29 }
 0x37c   :  { %2269 = vrot.lane.b32.xlu0 %v3731_v4, %s4038_s11  ;;  %1945 = vrot.lane.b32.xlu1 %v3731_v4, %s4036_s29 }
 0x380   :  { %2452 = vrot.lane.b32.xlu0 %v3727_v1, %s4039_s14  ;;  %2096 = vrot.lane.b32.xlu1 %v3726_v2, %s4037_s10 }
 0x384   :  { %2456 = vrot.lane.b32.xlu0 %v3729_v5, %s4039_s14  ;;  %2100 = vrot.lane.b32.xlu1 %v3728_v8, %s4037_s10 }
 0x388   :  { %2460 = vrot.lane.b32.xlu0 %v3731_v4, %s4039_s14  ;;  %2104 = vrot.lane.b32.xlu1 %v3730_v9, %s4037_s10 }
 0x38c   :  { %2792 = vrot.lane.b32.xlu0 %v4456_v10, %s4040_s17  ;;  %2259 = vrot.lane.b32.xlu1 %v3726_v2, %s4038_s11 }
 0x390   :  { %2796 = vrot.lane.b32.xlu0 %v4461_v11, %s4040_s17  ;;  %2263 = vrot.lane.b32.xlu1 %v3728_v8, %s4038_s11 }
 0x394   :  { %2800 = vrot.lane.b32.xlu0 %v4466_v13, %s4040_s17  ;;  %2267 = vrot.lane.b32.xlu1 %v3730_v9, %s4038_s11 }
 0x398   :  { %2961 = vrot.lane.b32.xlu0 %v4456_v10, %s4041_s20  ;;  %2450 = vrot.lane.b32.xlu1 %v3726_v2, %s4039_s14 }
 0x39c   :  { %2965 = vrot.lane.b32.xlu0 %v4461_v11, %s4041_s20  ;;  %2454 = vrot.lane.b32.xlu1 %v3728_v8, %s4039_s14 }
 0x3a0   :  { %2969 = vrot.lane.b32.xlu0 %v4466_v13, %s4041_s20  ;;  %2458 = vrot.lane.b32.xlu1 %v3730_v9, %s4039_s14 }
 0x3a4   :  { %3130 = vrot.lane.b32.xlu0 %v4456_v10, %s4042_s0  ;;  %2462 = vrot.lane.b32.xlu1 %v4024_v14, %s4039_s14 }
 0x3a8   :  { %3134 = vrot.lane.b32.xlu0 %v4461_v11, %s4042_s0  ;;  %2794 = vrot.lane.b32.xlu1 %v4483_v15, %s4040_s17 }
 0x3ac   :  { %3138 = vrot.lane.b32.xlu0 %v4466_v13, %s4042_s0  ;;  %2798 = vrot.lane.b32.xlu1 %v4489_v16, %s4040_s17 }
 0x3b0   :  { %3299 = vrot.lane.b32.xlu0 %v4456_v10, %s4043_s21  ;;  %2802 = vrot.lane.b32.xlu1 %v4495_v17, %s4040_s17 }
 0x3b4   :  { %3303 = vrot.lane.b32.xlu0 %v4461_v11, %s4043_s21  ;;  %2963 = vrot.lane.b32.xlu1 %v4483_v15, %s4041_s20 }
 0x3b8   :  { %3307 = vrot.lane.b32.xlu0 %v4466_v13, %s4043_s21  ;;  %2967 = vrot.lane.b32.xlu1 %v4489_v16, %s4041_s20 }
 0x3bc   :  { %2971 = vrot.lane.b32.xlu1 %v4495_v17, %s4041_s20 }
 0x3c0   :  { %3132 = vrot.lane.b32.xlu1 %v4483_v15, %s4042_s0 }
 0x3c4   :  { %3136 = vrot.lane.b32.xlu1 %v4489_v16, %s4042_s0 }
 0x3c8   :  { %3140 = vrot.lane.b32.xlu1 %v4495_v17, %s4042_s0 }
 0x3cc   :  { %3301 = vrot.lane.b32.xlu1 %v4483_v15, %s4043_s21 }
 0x3d0   :  { %3305 = vrot.lane.b32.xlu1 %v4489_v16, %s4043_s21 }
 0x3d4   :  { %3309 = vrot.lane.b32.xlu1 %v4495_v17, %s4043_s21 }
 0x3da   :  { %v1936_v18 = vpop.permute.xlu1 %1935  ;;  %v2099_v27 = vpop.permute.xlu0 %2098 }
 0x3de   :  { %v1938_v19 = vpop.permute.xlu1 %1937  ;;  %v2103_v43 = vpop.permute.xlu0 %2102 }
 0x3df   :  { %v1947_v20 = vsel %vm75_vm0, %v1936_v18, %v1938_v19 }
 0x3e0   :  { %v1956_v29 = vsel %vm1911_vm14, %v1947_v20, 0 }
 0x3e2   :  { %v1940_v22 = vpop.permute.xlu1 %1939  ;;  %v2107_v54 = vpop.permute.xlu0 %2106 }
 0x3e3   :  { %v1948_v28 = vsel %vm75_vm0, %v1938_v19, %v1940_v22 }
 0x3e4   :  { %3732 = vmatprep.subr.msk.bf16.mxu1 %vm1911_vm14, %v1948_v28  ;;  %v3751_v28 = vld [vmem:[%s4788_s4 + $0xc] sm:$0xf] }
 0x3e5   :  { %1974 = vmatpush1.bf16.msra.mxu1 %v1956_v29 }
 0x3e6   :  { %v1942_v31 = vpop.permute.xlu1 %1941  ;;  %v2262_v39 = vpop.permute.xlu0 %2261 }
 0x3e7   :  { %v1949_v32 = vsel %vm75_vm0, %v1940_v22, %v1942_v31 }
 0x3e8   :  { %3733 = vmatmul.mubr.msk.bf16.vlgmr.msra.gmra.mrb[0].mxu1 %vm1818_vm10, %v3725_v30  ;;  %v1962_v35 = vsel %vm1911_vm14, %v1949_v32, 0 }
 0x3e9   :  { %2046 = vmatprep.mubr.bf16.mxu1 %v4035_v7 }
 0x3ea   :  { %v1944_v33 = vpop.permute.xlu1 %1943  ;;  %v2266_v58 = vpop.permute.xlu0 %2265 }
 0x3eb   :  { %v1950_v34 = vsel %vm75_vm0, %v1942_v31, %v1944_v33 }
 0x3ec   :  { %3734 = vmatprep.subr.msk.bf16.mxu1 %vm1911_vm14, %v1950_v34 }
 0x3ed   :  { %2015 = vmatpush1.bf16.msra.mxu1 %v1962_v35  ;;  %v2644_v35 = vsel %vm1911_vm14, %v4456_v10, 0 }
 0x3ee   :  { %v1946_v36 = vpop.permute.xlu1 %1945  ;;  %v2270_v3 = vpop.permute.xlu0 %2269 }
 0x3ef   :  { %v1951_v37 = vsel %vm75_vm0, %v1944_v33, %v1946_v36  ;;  %3736 = vmatprep.subr.msk.bf16.mxu1 %vm1911_vm14, %v1946_v36  ;;  %v3765_v36 = vld [vmem:[%s4788_s4 + $0x10] sm:$0xf]  ;;  %vm3533_vm0 = vcmask 228416  }
 0x3f0   :  { %v1968_v21 = vsel %vm1911_vm14, %v1951_v37, 0  ;;  %3735 = vmatmul.mubr.msk.bf16.vlgmr.msra.gmra.mrb[4].mxu1 %vm1818_vm10, %v3725_v30 }
 0x3f1   :  { %2056 = vmatpush1.bf16.msra.mxu1 %v1968_v21  ;;  %2087 = vmatprep.mubr.bf16.mxu1 %v4035_v7 }
 0x3f2   :  { %v2097_v24 = vpop.permute.xlu1 %2096  ;;  %v2453_v4 = vpop.permute.xlu0 %2452 }
 0x3f3   :  { %v2108_v40 = vsel %vm239_vm3, %v2097_v24, %v2099_v27 }
 0x3f4   :  { %v2117_v42 = vsel %vm1911_vm14, %v2108_v40, 0 }
 0x3f6   :  { %v2101_v41 = vpop.permute.xlu1 %2100  ;;  %v2457_v18 = vpop.permute.xlu0 %2456 }
 0x3f7   :  { %v2109_v26 = vsel %vm239_vm3, %v2099_v27, %v2101_v41  ;;  %v2110_v47 = vsel %vm239_vm3, %v2101_v41, %v2103_v43 }
 0x3f8   :  { %3737 = vmatmul.mubr.msk.bf16.vlgmr.msra.gmra.mrb[8].mxu1 %vm1818_vm10, %v3725_v30  ;;  %3738 = vmatprep.subr.msk.bf16.mxu1 %vm1911_vm14, %v2109_v26  ;;  %v2123_v52 = vsel %vm1911_vm14, %v2110_v47, 0  ;;  %v3778_v26 = vld [vmem:[%s4788_s4 + $0x14] sm:$0xf] }
 0x3f9   :  { %2135 = vmatpush1.bf16.msra.mxu1 %v2117_v42  ;;  %2166 = vmatprep.mubr.bf16.mxu1 %v4035_v7 }
 0x3fa   :  { %v2105_v44 = vpop.permute.xlu1 %2104  ;;  %v2461_v30 = vpop.permute.xlu0 %2460 }
 0x3fb   :  { %v2111_v45 = vsel %vm239_vm3, %v2103_v43, %v2105_v44  ;;  %v2112_v55 = vsel %vm239_vm3, %v2105_v44, %v2107_v54 }
 0x3fc   :  { %3740 = vmatprep.subr.msk.bf16.mxu1 %vm1911_vm14, %v2111_v45  ;;  %v2129_v49 = vsel %vm1911_vm14, %v2112_v55, 0 }
 0x3fe   :  { %v2260_v53 = vpop.permute.xlu1 %2259  ;;  %v2793_v37 = vpop.permute.xlu0 %2792 }
 0x3ff   :  { %v2271_v56 = vsel %vm432_vm4, %v2260_v53, %v2262_v39 }
 0x400   :  { %3739 = vmatmul.mubr.msk.bf16.vlgmr.msra.gmra.mrb[0].mxu1 %vm1818_vm10, %v1914_v50  ;;  %v2280_v59 = vsel %vm1911_vm14, %v2271_v56, 0  ;;  %v3785_v56 = vld [vmem:[%s4788_s4 + $0x18] sm:$0xf] }
 0x401   :  { %2176 = vmatpush1.bf16.msra.mxu1 %v2123_v52  ;;  %2207 = vmatprep.mubr.bf16.mxu1 %v4035_v7 }
 0x402   :  { %3742 = vmatprep.subr.msk.bf16.mxu1 %vm1911_vm14, %v2107_v54  ;;  %v2264_v38 = vpop.permute.xlu1 %2263  ;;  %v2797_v21 = vpop.permute.xlu0 %2796 }
 0x403   :  { %v2272_v51 = vsel %vm432_vm4, %v2262_v39, %v2264_v38  ;;  %v2273_v61 = vsel %vm432_vm4, %v2264_v38, %v2266_v58 }
 0x404   :  { %v2286_v1 = vsel %vm1911_vm14, %v2273_v61, 0 }
 0x406   :  { %v2268_v57 = vpop.permute.xlu1 %2267  ;;  %v2801_v40 = vpop.permute.xlu0 %2800 }
 0x407   :  { %v2274_v60 = vsel %vm432_vm4, %v2266_v58, %v2268_v57  ;;  %v2275_v5 = vsel %vm432_vm4, %v2268_v57, %v2270_v3 }
 0x408   :  { %3741 = vmatmul.mubr.msk.bf16.vlgmr.msra.gmra.mrb[4].mxu1 %vm1818_vm10, %v1914_v50  ;;  %v2292_v8 = vsel %vm1911_vm14, %v2275_v5, 0 }
 0x409   :  { %2217 = vmatpush1.bf16.msra.mxu1 %v2129_v49  ;;  %2248 = vmatprep.mubr.bf16.mxu1 %v4035_v7 }
 0x40a   :  { %3745 = vmatprep.subr.msk.bf16.mxu1 %vm1911_vm14, %v2272_v51  ;;  %v2451_v2 = vpop.permute.xlu1 %2450  ;;  %v2962_v44 = vpop.permute.xlu0 %2961 }
 0x40b   :  { %v2464_v12 = vsel %vm641_vm5, %v2451_v2, %v2453_v4 }
 0x40c   :  { %v2474_v19 = vsel %vm1911_vm14, %v2464_v12, 0  ;;  %v3792_v12 = vld [vmem:[%s4788_s4 + $0x1c] sm:$0xf] }
 0x40e   :  { %v2455_v6 = vpop.permute.xlu1 %2454 }
 0x40f   :  { %v2465_v9 = vsel %vm641_vm5, %v2453_v4, %v2455_v6  ;;  %v2466_v22 = vsel %vm641_vm5, %v2455_v6, %v2457_v18 }
 0x410   :  { %3743 = vmatmul.mubr.msk.bf16.vlgmr.msra.gmra.mrb[8].mxu1 %vm1818_vm10, %v1914_v50  ;;  %v2480_v31 = vsel %vm1911_vm14, %v2466_v22, 0  ;;  %v2966_v50 = vpop.permute.xlu0 %2965 }
 0x411   :  { %2298 = vmatpush1.bf16.msra.mxu1 %v2280_v59  ;;  %2329 = vmatprep.mubr.bf16.mxu1 %v4035_v7 }
 0x412   :  { %3747 = vmatprep.subr.msk.bf16.mxu1 %vm1911_vm14, %v2274_v60  ;;  %v2459_v14 = vpop.permute.xlu1 %2458 }
 0x413   :  { %v2467_v20 = vsel %vm641_vm5, %v2457_v18, %v2459_v14  ;;  %v2468_v33 = vsel %vm641_vm5, %v2459_v14, %v2461_v30 }
 0x414   :  { %v2486_v34 = vsel %vm1911_vm14, %v2468_v33, 0  ;;  %v2970_v38 = vpop.permute.xlu0 %2969 }
 0x416   :  { %v2463_v29 = vpop.permute.xlu1 %2462 }
 0x417   :  { %v2469_v32 = vsel %vm641_vm5, %v2461_v30, %v2463_v29 }
 0x418   :  { %3746 = vmatmul.mubr.msk.bf16.vlgmr.msra.gmra.mrb[0].mxu1 %vm1818_vm10, %v3744_v0  ;;  %v3131_v59 = vpop.permute.xlu0 %3130 }
 0x419   :  { %2339 = vmatpush1.bf16.msra.mxu1 %v2286_v1  ;;  %2370 = vmatprep.mubr.bf16.mxu1 %v4035_v7 }
 0x41a   :  { %3749 = vmatprep.subr.msk.bf16.mxu1 %vm1911_vm14, %v2270_v3  ;;  %v2795_v10 = vpop.permute.xlu1 %2794 }
 0x41b   :  { %v2805_v24 = vsel %vm1022_vm6, %v2795_v10, %v2797_v21 }
 0x41e   :  { %v2799_v27 = vpop.permute.xlu1 %2798 }
 0x41f   :  { %v2807_v41 = vsel %vm1022_vm6, %v2799_v27, %v2801_v40 }
 0x420   :  { %3748 = vmatmul.mubr.msk.bf16.vlgmr.msra.gmra.mrb[4].mxu1 %vm1818_vm10, %v3744_v0 }
 0x421   :  { %2380 = vmatpush1.bf16.msra.mxu1 %v2292_v8  ;;  %2411 = vmatprep.mubr.bf16.mxu1 %v4035_v7 }
 0x422   :  { %3759 = vmatprep.subr.msk.bf16.mxu1 %vm1911_vm14, %v2465_v9  ;;  %v2803_v43 = vpop.permute.xlu1 %2802 }
 0x423   :  { %v2808_v45 = vsel %vm1022_vm6, %v2801_v40, %v2803_v43 }
 0x424   :  { %v2825_v52 = vsel %vm1911_vm14, %v2808_v45, 0 }
 0x426   :  { %v2964_v47 = vpop.permute.xlu1 %2963 }
 0x427   :  { %v2974_v53 = vsel %vm1221_vm7, %v2964_v47, %v2966_v50  ;;  %v2973_v54 = vsel %vm1221_vm7, %v2962_v44, %v2964_v47 }
 0x428   :  { %3750 = vmatmul.mubr.msk.bf16.vlgmr.msra.gmra.mrb[8].mxu1 %vm1818_vm10, %v3744_v0  ;;  %v2982_v39 = vsel %vm1911_vm14, %v2973_v54, 0  ;;  %v3135_v0 = vpop.permute.xlu0 %3134 }
 0x429   :  { %2492 = vmatpush1.bf16.msra.mxu1 %v2474_v19  ;;  %2523 = vmatprep.mubr.bf16.mxu1 %v4035_v7 }
 0x42a   :  { %3761 = vmatprep.subr.msk.bf16.mxu1 %vm1911_vm14, %v2467_v20  ;;  %v2968_v55 = vpop.permute.xlu1 %2967 }
 0x42b   :  { %v2976_v49 = vsel %vm1221_vm7, %v2968_v55, %v2970_v38  ;;  %v2975_v51 = vsel %vm1221_vm7, %v2966_v50, %v2968_v55 }
 0x42c   :  { %v2988_v57 = vsel %vm1911_vm14, %v2975_v51, 0  ;;  %v3139_v6 = vpop.permute.xlu0 %3138 }
 0x42e   :  { %v2972_v58 = vpop.permute.xlu1 %2971 }
 0x42f   :  { %v2977_v60 = vsel %vm1221_vm7, %v2970_v38, %v2972_v58 }
 0x430   :  { %3760 = vmatmul.mubr.msk.bf16.vlgmr.msra.gmra.mrb[0].mxu1 %vm1818_vm10, %v3751_v28  ;;  %v2994_v1 = vsel %vm1911_vm14, %v2977_v60, 0  ;;  %v3300_v19 = vpop.permute.xlu0 %3299 }
 0x431   :  { %2533 = vmatpush1.bf16.msra.mxu1 %v2480_v31  ;;  %2564 = vmatprep.mubr.bf16.mxu1 %v4035_v7 }
 0x432   :  { %3763 = vmatprep.subr.msk.bf16.mxu1 %vm1911_vm14, %v2469_v32  ;;  %v3133_v61 = vpop.permute.xlu1 %3132 }
 0x433   :  { %v3143_v2 = vsel %vm1420_vm8, %v3133_v61, %v3135_v0  ;;  %v3142_v3 = vsel %vm1420_vm8, %v3131_v59, %v3133_v61 }
 0x434   :  { %v3151_v4 = vsel %vm1911_vm14, %v3142_v3, 0 }
 0x436   :  { %v3137_v5 = vpop.permute.xlu1 %3136 }
 0x437   :  { %v3145_v8 = vsel %vm1420_vm8, %v3137_v5, %v3139_v6  ;;  %v3144_v9 = vsel %vm1420_vm8, %v3135_v0, %v3137_v5 }
 0x438   :  { %3762 = vmatmul.mubr.msk.bf16.vlgmr.msra.gmra.mrb[4].mxu1 %vm1818_vm10, %v3751_v28  ;;  %v3157_v14 = vsel %vm1911_vm14, %v3144_v9, 0  ;;  %v3466_v9 = vld [vmem:[%s4789_s5] sm:$0xff] }
 0x439   :  { %2574 = vmatpush1.bf16.msra.mxu1 %v2486_v34  ;;  %2605 = vmatprep.mubr.bf16.mxu1 %v4035_v7 }
 0x43a   :  { %3772 = vmatprep.subr.msk.bf16.mxu1 %vm1911_vm14, %v4483_v15  ;;  %v2650_v15 = vsel %vm1911_vm14, %v4461_v11, 0  ;;  %v2804_v11 = vsel %vm1022_vm6, %v2793_v37, %v2795_v10  ;;  %v3141_v18 = vpop.permute.xlu1 %3140 }
 0x43b   :  { %v3146_v20 = vsel %vm1420_vm8, %v3139_v6, %v3141_v18 }
 0x43c   :  { %v3163_v29 = vsel %vm1911_vm14, %v3146_v20, 0 }
 0x43e   :  { %v3302_v22 = vpop.permute.xlu1 %3301 }
 0x43f   :  { %v3311_v31 = vsel %vm1619_vm9, %v3300_v19, %v3302_v22 }
 0x440   :  { %3764 = vmatmul.mubr.msk.bf16.vlgmr.msra.gmra.mrb[8].mxu1 %vm1818_vm10, %v3751_v28  ;;  %v3304_v28 = vpop.permute.xlu0 %3303  ;;  %v3320_v34 = vsel %vm1911_vm14, %v3311_v31, 0 }
 0x441   :  { %2662 = vmatpush1.bf16.msra.mxu1 %v2644_v35  ;;  %2693 = vmatprep.mubr.bf16.mxu1 %v4035_v7  ;;  %v3312_v30 = vsel %vm1619_vm9, %v3302_v22, %v3304_v28  ;;  %v4044_v22 = vmov 0.0  }
 0x442   :  { %3774 = vmatprep.subr.msk.bf16.mxu1 %vm1911_vm14, %v4489_v16  ;;  %v2656_v16 = vsel %vm1911_vm14, %v4466_v13, 0  ;;  %v2806_v13 = vsel %vm1022_vm6, %v2797_v21, %v2799_v27  ;;  %v3306_v32 = vpop.permute.xlu1 %3305  ;;  %3534 = vst.msk [vmem:[#allocation3 + $0x28] sm:$0xff] %vm3533_vm0, %v4044_v22 }
 0x443   :  { %v2819_v42 = vsel %vm1911_vm14, %v2806_v13, 0 }
 0x444   :  { %v3308_v33 = vpop.permute.xlu0 %3307 }
 0x445   :  { %v3314_v35 = vsel %vm1619_vm9, %v3306_v32, %v3308_v33 }
 0x446   :  { %v3310_v10 = vpop.permute.xlu1 %3309 }
 0x447   :  { %v3315_v21 = vsel %vm1619_vm9, %v3308_v33, %v3310_v10 }
 0x448   :  { %3773 = vmatmul.mubr.msk.bf16.vlgmr.msra.gmra.mrb[0].mxu1 %vm1818_vm10, %v3765_v36 }
 0x449   :  { %2703 = vmatpush1.bf16.msra.mxu1 %v2650_v15  ;;  %2734 = vmatprep.mubr.bf16.mxu1 %v4035_v7  ;;  %v3799_v15 = vld [vmem:[%s4788_s4 + $0x20] sm:$0xf] }
 0x44a   :  { %3776 = vmatprep.subr.msk.bf16.mxu1 %vm1911_vm14, %v4495_v17  ;;  %v2813_v17 = vsel %vm1911_vm14, %v2804_v11, 0 }
 0x450   :  { %3775 = vmatmul.mubr.msk.bf16.vlgmr.msra.gmra.mrb[4].mxu1 %vm1818_vm10, %v3765_v36 }
 0x451   :  { %2744 = vmatpush1.bf16.msra.mxu1 %v2656_v16  ;;  %2775 = vmatprep.mubr.bf16.mxu1 %v4035_v7  ;;  %v3332_v16 = vsel %vm1911_vm14, %v3315_v21, 0 }
 0x452   :  { %3779 = vmatprep.subr.msk.bf16.mxu1 %vm1911_vm14, %v2805_v24 }
 0x458   :  { %3777 = vmatmul.mubr.msk.bf16.vlgmr.msra.gmra.mrb[8].mxu1 %vm1818_vm10, %v3765_v36  ;;  %v3313_v36 = vsel %vm1619_vm9, %v3304_v28, %v3306_v32 }
 0x459   :  { %2831 = vmatpush1.bf16.msra.mxu1 %v2813_v17  ;;  %2862 = vmatprep.mubr.bf16.mxu1 %v4035_v7  ;;  %v3326_v37 = vsel %vm1911_vm14, %v3313_v36, 0 }
 0x45a   :  { %3781 = vmatprep.subr.msk.bf16.mxu1 %vm1911_vm14, %v2807_v41 }
 0x460   :  { %3780 = vmatmul.mubr.msk.bf16.vlgmr.msra.gmra.mrb[0].mxu1 %vm1818_vm10, %v3778_v26 }
 0x461   :  { %2872 = vmatpush1.bf16.msra.mxu1 %v2819_v42  ;;  %2903 = vmatprep.mubr.bf16.mxu1 %v4035_v7 }
 0x462   :  { %3783 = vmatprep.subr.msk.bf16.mxu1 %vm1911_vm14, %v2803_v43 }
 0x468   :  { %3782 = vmatmul.mubr.msk.bf16.vlgmr.msra.gmra.mrb[4].mxu1 %vm1818_vm10, %v3778_v26 }
 0x469   :  { %2913 = vmatpush1.bf16.msra.mxu1 %v2825_v52  ;;  %2944 = vmatprep.mubr.bf16.mxu1 %v4035_v7 }
 0x46a   :  { %3786 = vmatprep.subr.msk.bf16.mxu1 %vm1911_vm14, %v2974_v53 }
 0x470   :  { %3784 = vmatmul.mubr.msk.bf16.vlgmr.msra.gmra.mrb[8].mxu1 %vm1818_vm10, %v3778_v26 }
 0x471   :  { %3000 = vmatpush1.bf16.msra.mxu1 %v2982_v39  ;;  %3031 = vmatprep.mubr.bf16.mxu1 %v4035_v7 }
 0x472   :  { %3788 = vmatprep.subr.msk.bf16.mxu1 %vm1911_vm14, %v2976_v49 }
 0x478   :  { %3787 = vmatmul.mubr.msk.bf16.vlgmr.msra.gmra.mrb[0].mxu1 %vm1818_vm10, %v3785_v56 }
 0x479   :  { %3041 = vmatpush1.bf16.msra.mxu1 %v2988_v57  ;;  %3072 = vmatprep.mubr.bf16.mxu1 %v4035_v7 }
 0x47a   :  { %3790 = vmatprep.subr.msk.bf16.mxu1 %vm1911_vm14, %v2972_v58 }
 0x480   :  { %3789 = vmatmul.mubr.msk.bf16.vlgmr.msra.gmra.mrb[4].mxu1 %vm1818_vm10, %v3785_v56 }
 0x481   :  { %3082 = vmatpush1.bf16.msra.mxu1 %v2994_v1  ;;  %3113 = vmatprep.mubr.bf16.mxu1 %v4035_v7 }
 0x482   :  { %3793 = vmatprep.subr.msk.bf16.mxu1 %vm1911_vm14, %v3143_v2 }
 0x488   :  { %3791 = vmatmul.mubr.msk.bf16.vlgmr.msra.gmra.mrb[8].mxu1 %vm1818_vm10, %v3785_v56 }
 0x489   :  { %3169 = vmatpush1.bf16.msra.mxu1 %v3151_v4  ;;  %3200 = vmatprep.mubr.bf16.mxu1 %v4035_v7 }
 0x48a   :  { %3795 = vmatprep.subr.msk.bf16.mxu1 %vm1911_vm14, %v3145_v8 }
 0x490   :  { %3794 = vmatmul.mubr.msk.bf16.vlgmr.msra.gmra.mrb[0].mxu1 %vm1818_vm10, %v3792_v12 }
 0x491   :  { %3210 = vmatpush1.bf16.msra.mxu1 %v3157_v14  ;;  %3241 = vmatprep.mubr.bf16.mxu1 %v4035_v7 }
 0x492   :  { %3797 = vmatprep.subr.msk.bf16.mxu1 %vm1911_vm14, %v3141_v18  ;;  %v3467_v18 = vld [vmem:[%s4790_s6] sm:$0xff] }
 0x498   :  { %3796 = vmatmul.mubr.msk.bf16.vlgmr.msra.gmra.mrb[4].mxu1 %vm1818_vm10, %v3792_v12 }
 0x499   :  { %3251 = vmatpush1.bf16.msra.mxu1 %v3163_v29  ;;  %3282 = vmatprep.mubr.bf16.mxu1 %v4035_v7 }
 0x49a   :  { %3800 = vmatprep.subr.msk.bf16.mxu1 %vm1911_vm14, %v3312_v30 }
 0x4a0   :  { %3798 = vmatmul.mubr.msk.bf16.vlgmr.msra.gmra.mrb[8].mxu1 %vm1818_vm10, %v3792_v12 }
 0x4a1   :  { %3338 = vmatpush1.bf16.msra.mxu1 %v3320_v34  ;;  %3369 = vmatprep.mubr.bf16.mxu1 %v4035_v7 }
 0x4a2   :  { %3802 = vmatprep.subr.msk.bf16.mxu1 %vm1911_vm14, %v3314_v35 }
 0x4a8   :  { %3801 = vmatmul.mubr.msk.bf16.vlgmr.msra.gmra.mrb[0].mxu1 %vm1818_vm10, %v3799_v15 }
 0x4a9   :  { %3379 = vmatpush1.bf16.msra.mxu1 %v3326_v37  ;;  %3410 = vmatprep.mubr.bf16.mxu1 %v4035_v7 }
 0x4aa   :  { %3804 = vmatprep.subr.msk.bf16.mxu1 %vm1911_vm14, %v3310_v10 }
 0x4b0   :  { %3803 = vmatmul.mubr.msk.bf16.vlgmr.msra.gmra.mrb[4].mxu1 %vm1818_vm10, %v3799_v15 }
 0x4b1   :  { %3420 = vmatpush1.bf16.msra.mxu1 %v3332_v16  ;;  %3451 = vmatprep.mubr.bf16.mxu1 %v4035_v7 }
 0x4b8   :  { %3805 = vmatmul.mubr.msk.bf16.vlgmr.msra.gmra.mrb[8].mxu1 %vm1818_vm10, %v3799_v15 }
 0x57b   :  { %v3371_v24 = vpop.f32.mrb[0].mxu1 }
 0x57c   :  { %v3468_v11 = vmul.f32 %v3371_v24, %v4390_v23  ;;  %v3373_v27 = vpop.f32.mrb[1].mxu1 }
 0x57d   :  { %v3469_v40 = vmul.f32 %v3373_v27, %v4392_v25  ;;  %v3375_v17 = vpop.f32.mrb[2].mxu1 }
 0x57e   :  { %v3483_v41 = vmul.f32 %v3468_v11, %v3468_v11  ;;  %v3376_v13 = vpop.f32.mrb[3].mxu1 }
 0x57f   :  { %v3474_v26 = vadd.f32 %v3469_v40, %v3468_v11  ;;  %v3484_v42 = vmul.f32 %v3469_v40, %v3469_v40 }
 0x581   :  { %v3489_v43 = vadd.f32 %v3484_v42, %v3483_v41 }
 0x583   :  { %v3412_v44 = vpop.f32.mrb[4].mxu1 }
 0x584   :  { %v3470_v45 = vmul.f32 %v3412_v44, %v4404_v46  ;;  %v3414_v47 = vpop.f32.mrb[5].mxu1 }
 0x585   :  { %v3471_v7 = vmul.f32 %v3414_v47, %v4406_v48  ;;  %v3416_v50 = vpop.f32.mrb[6].mxu1 }
 0x586   :  { %v3475_v52 = vadd.f32 %v3474_v26, %v3470_v45  ;;  %v3485_v53 = vmul.f32 %v3470_v45, %v3470_v45  ;;  %v3417_v54 = vpop.f32.mrb[7].mxu1 }
 0x587   :  { %v3486_v23 = vmul.f32 %v3471_v7, %v3471_v7 }
 0x588   :  { %v3490_v55 = vadd.f32 %v3489_v43, %v3485_v53  ;;  %v3476_v38 = vadd.f32 %v3475_v52, %v3471_v7 }
 0x58a   :  { %v3491_v25 = vadd.f32 %v3490_v55, %v3486_v23 }
 0x58b   :  { %v3453_v39 = vpop.f32.mrb[8].mxu1 }
 0x58c   :  { %v3472_v49 = vmul.f32 %v3453_v39, %v4412_v62  ;;  %v3455_v51 = vpop.f32.mrb[9].mxu1 }
 0x58d   :  { %v3473_v56 = vmul.f32 %v3455_v51, %v4414_v63  ;;  %v3457_v57 = vpop.f32.mrb[10].mxu1 }
 0x58e   :  { %v3487_v58 = vmul.f32 %v3472_v49, %v3472_v49  ;;  %v3458_v46 = vpop.f32.mrb[11].mxu1  ;;  %v3477_v59 = vadd.f32 %v3476_v38, %v3472_v49 }
 0x58f   :  { %v3488_v60 = vmul.f32 %v3473_v56, %v3473_v56  ;;  %v3478_v48 = vsel %vm1818_vm10, %v3473_v56, 0.0 }
 0x590   :  { %v3492_v61 = vadd.f32 %v3491_v25, %v3487_v58  ;;  %v3479_v0 = vadd.f32 %v3478_v48, %v3477_v59 }
 0x591   :  { %v3493_v1 = vsel %vm1818_vm10, %v3488_v60, 0.0 }
 0x592   :  { %3480 = vadd.xlane.f32.xlu0 %v3479_v0  ;;  %v3494_v2 = vadd.f32 %v3493_v1, %v3492_v61 }
 0x594   :  { %3495 = vadd.xlane.f32.xlu1 %v3494_v2 }
 0x61f   :  { %v3481_v3 = vpop.xlane.xlu0 %3480 }
 0x620   :  { %v3482_v5 = vmul.f32 0.001953125, %v3481_v3 }
 0x621   :  { %v3496_v62 = vpop.xlane.xlu1 %3495 }
 0x622   :  { %v3498_v6 = vmul.f32 %v3482_v5, %v3482_v5  ;;  %v3497_v4 = vmul.f32 0.001953125, %v3496_v62 }
 0x624   :  { %v3499_v63 = vsub.f32 %v3497_v4, %v3498_v6 }
 0x626   :  { %v3500_v8 = vadd.f32 1e-05, %v3499_v63 }
 0x628   :  { %4028 = vrsqrt.f32 %v3500_v8 }
 0x632   :  { %v4029_v12 = vpop.eup %4028 }
 0x633   :  { %v3502_v14 = vmul.f32 %v4029_v12, %v3466_v9 }
 0x635   :  { %3507 = vperm.xlu0 %4012, %v3502_v14   ;;  %v3503_v19 = vmul.f32 %v3502_v14, %v3482_v5 }
 0x637   :  { %v3504_v20 = vsub.f32 %v3467_v18, %v3503_v19 }
 0x639   :  { %3518 = vperm.xlu1 %4013, %v3504_v20  }
 0x6b4   :  { %v3508_v28 = vpop.permute.xlu0 %3507 }
 0x6b5   :  { %v3510_v29 = vmul.f32 %v3508_v28, %v3371_v24  ;;  %v3511_v30 = vmul.f32 %v3508_v28, %v3373_v27  ;;  %v3512_v31 = vmul.f32 %v3508_v28, %v3412_v44  ;;  %v3513_v32 = vmul.f32 %v3508_v28, %v3414_v47 }
 0x6b6   :  { %v3514_v33 = vmul.f32 %v3508_v28, %v3453_v39  ;;  %v3515_v34 = vmul.f32 %v3508_v28, %v3455_v51 }
 0x6b8   :  { %v3519_v35 = vpop.permute.xlu1 %3518 }
 0x6b9   :  { %v3521_v36 = vadd.f32 %v3519_v35, %v3510_v29  ;;  %v3522_v15 = vadd.f32 %v3519_v35, %v3511_v30  ;;  %v3523_v37 = vadd.f32 %v3519_v35, %v3512_v31  ;;  %v3524_v10 = vadd.f32 %v3519_v35, %v3513_v32 }
 0x6ba   :  { %v3525_v21 = vadd.f32 %v3519_v35, %v3514_v33  ;;  %v3526_v16 = vadd.f32 %v3519_v35, %v3515_v34 }
 0x6bb   :  { %v3527_v11 = vmax.f32 %v3521_v36, 0.0  ;;  %v3528_v40 = vmax.f32 %v3522_v15, 0.0  ;;  %v3529_v17 = vmax.f32 %v3523_v37, 0.0  ;;  %v4718_v41 = vmax.f32 %v3524_v10, 0.0 }
 0x6bc   :  { %v4720_v13 = vmax.f32 %v3525_v21, 0.0  ;;  %v3532_v24 = vmax.f32 %v3526_v16, 0.0 }
 0x6bd   :  { %3555 = vrot.lane.b32.xlu1 %v3528_v40, %s4040_s17  ;;  %3553 = vrot.lane.b32.xlu0 %v3527_v11, %s4040_s17 }
 0x6be   :  { %3540 = vst.msk [vmem:[#allocation3 + $0x28] sm:$0xff] %vm1818_vm10, %v3532_v24 }
 0x6c1   :  { %3559 = vrot.lane.b32.xlu1 %v4718_v41, %s4040_s17  ;;  %3557 = vrot.lane.b32.xlu0 %v3529_v17, %s4040_s17 }
 0x6c5   :  { %v3546_v27 = vld [vmem:[#allocation3 + $0x28] sm:$0xff]  ;;  %3561 = vrot.lane.b32.xlu0 %v4720_v13, %s4040_s17 }
 0x6c6   :  { %3563 = vrot.lane.b32.xlu1 %v3546_v27, %s4040_s17 }
 0x6c9   :  { %3583 = vrot.lane.b32.xlu0 %v3527_v11, %s4042_s0 }
 0x6ca   :  { %3585 = vrot.lane.b32.xlu1 %v3528_v40, %s4042_s0 }
 0x6cd   :  { %3587 = vrot.lane.b32.xlu0 %v3529_v17, %s4042_s0 }
 0x6ce   :  { %3589 = vrot.lane.b32.xlu1 %v4718_v41, %s4042_s0 }
 0x6d1   :  { %3591 = vrot.lane.b32.xlu0 %v4720_v13, %s4042_s0 }
 0x6d2   :  { %3593 = vrot.lane.b32.xlu1 %v3546_v27, %s4042_s0 }
 0x6d5   :  { %3613 = vrot.lane.b32.xlu0 %v3527_v11, %s4043_s21 }
 0x6d6   :  { %3615 = vrot.lane.b32.xlu1 %v3528_v40, %s4043_s21 }
 0x6d9   :  { %3617 = vrot.lane.b32.xlu0 %v3529_v17, %s4043_s21 }
 0x6da   :  { %3619 = vrot.lane.b32.xlu1 %v4718_v41, %s4043_s21 }
 0x6dd   :  { %3621 = vrot.lane.b32.xlu0 %v4720_v13, %s4043_s21 }
 0x6de   :  { %3623 = vrot.lane.b32.xlu1 %v3546_v27, %s4043_s21 }
 0x72f   :  { %v3556_v26 = vpop.permute.xlu1 %3555  ;;  %v3554_v42 = vpop.permute.xlu0 %3553 }
 0x730   :  { %v3566_v54 = vsel %vm1022_vm6, %v3554_v42, %v3556_v26 }
 0x731   :  { %v3577_v25 = vmax.f32 %v3527_v11, %v3566_v54 }
 0x733   :  { %v3560_v43 = vpop.permute.xlu1 %3559  ;;  %v3558_v44 = vpop.permute.xlu0 %3557 }
 0x734   :  { %v3567_v39 = vsel %vm1022_vm6, %v3556_v26, %v3558_v44  ;;  %v3568_v49 = vsel %vm1022_vm6, %v3558_v44, %v3560_v43 }
 0x735   :  { %v3578_v46 = vmax.f32 %v3528_v40, %v3567_v39  ;;  %v3579_v48 = vmax.f32 %v3529_v17, %v3568_v49 }
 0x737   :  { %v3562_v45 = vpop.permute.xlu0 %3561 }
 0x738   :  { %v3564_v47 = vpop.permute.xlu1 %3563  ;;  %v3569_v61 = vsel %vm1022_vm6, %v3560_v43, %v3562_v45 }
 0x739   :  { %v3570_v1 = vsel %vm1022_vm6, %v3562_v45, %v3564_v47  ;;  %v3582_v5 = vmax.f32 %v3532_v24, %v3564_v47  ;;  %v3580_v8 = vmax.f32 %v4718_v41, %v3569_v61 }
 0x73a   :  { %v3581_v18 = vmax.f32 %v4720_v13, %v3570_v1 }
 0x73b   :  { %v3584_v7 = vpop.permute.xlu0 %3583 }
 0x73c   :  { %v3586_v50 = vpop.permute.xlu1 %3585 }
 0x73d   :  { %v3596_v38 = vsel %vm1420_vm8, %v3584_v7, %v3586_v50 }
 0x73e   :  { %v3607_v56 = vmax.f32 %v3577_v25, %v3596_v38 }
 0x73f   :  { %v3588_v52 = vpop.permute.xlu0 %3587 }
 0x740   :  { %v3590_v53 = vpop.permute.xlu1 %3589  ;;  %v3597_v57 = vsel %vm1420_vm8, %v3586_v50, %v3588_v52 }
 0x741   :  { %v3598_v59 = vsel %vm1420_vm8, %v3588_v52, %v3590_v53  ;;  %v3608_v2 = vmax.f32 %v3578_v46, %v3597_v57 }
 0x742   :  { %v3609_v62 = vmax.f32 %v3579_v48, %v3598_v59 }
 0x743   :  { %v3592_v23 = vpop.permute.xlu0 %3591 }
 0x744   :  { %v3594_v55 = vpop.permute.xlu1 %3593  ;;  %v3599_v6 = vsel %vm1420_vm8, %v3590_v53, %v3592_v23 }
 0x745   :  { %v3600_v9 = vsel %vm1420_vm8, %v3592_v23, %v3594_v55  ;;  %v3612_v20 = vmax.f32 %v3582_v5, %v3594_v55  ;;  %v3610_v22 = vmax.f32 %v3580_v8, %v3599_v6 }
 0x746   :  { %v3611_v29 = vmax.f32 %v3581_v18, %v3600_v9 }
 0x747   :  { %v3614_v51 = vpop.permute.xlu0 %3613 }
 0x748   :  { %v3616_v58 = vpop.permute.xlu1 %3615 }
 0x749   :  { %v3626_v60 = vsel %vm1619_vm9, %v3614_v51, %v3616_v58 }
 0x74a   :  { %v3637_v0 = vmax.f32 %v3607_v56, %v3626_v60 }
 0x74b   :  { %v3618_v3 = vpop.permute.xlu0 %3617 }
 0x74c   :  { %3643 = vst [vmem:[%s4791_s8] sm:$0xff] %v3637_v0  ;;  %v3620_v4 = vpop.permute.xlu1 %3619  ;;  %v3627_v63 = vsel %vm1619_vm9, %v3616_v58, %v3618_v3 }
 0x74d   :  { %v3628_v12 = vsel %vm1619_vm9, %v3618_v3, %v3620_v4  ;;  %v3638_v14 = vmax.f32 %v3608_v2, %v3627_v63 }
 0x74e   :  { %v3639_v19 = vmax.f32 %v3609_v62, %v3628_v12 }
 0x74f   :  { %3644 = vst [vmem:[%s4791_s8 + $0x8] sm:$0xff] %v3638_v14  ;;  %v3622_v28 = vpop.permute.xlu0 %3621 }
 0x750   :  { %3645 = vst [vmem:[%s4791_s8 + $0x10] sm:$0xff] %v3639_v19  ;;  %v3624_v30 = vpop.permute.xlu1 %3623  ;;  %v3629_v31 = vsel %vm1619_vm9, %v3620_v4, %v3622_v28 }
 0x751   :  { %v3642_v32 = vmax.f32 %v3612_v20, %v3624_v30  ;;  %v3630_v33 = vsel %vm1619_vm9, %v3622_v28, %v3624_v30  ;;  %v3640_v34 = vmax.f32 %v3610_v22, %v3629_v31 }
 0x752   :  { %v3641_v35 = vmax.f32 %v3611_v29, %v3630_v33 }
 0x753   :  { %3648 = vst.msk [vmem:[%s4791_s8 + $0x28] sm:$0xff] %vm1818_vm10, %v3642_v32  ;;  %3646 = vst [vmem:[%s4791_s8 + $0x18] sm:$0xff] %v3640_v34 }
 0x754   :  { %3647 = vst [vmem:[%s4791_s8 + $0x20] sm:$0xff] %v3641_v35 }

</bundles_post_ra>
